<compile_context>
chip_gen: v7x
topology: tpu7x:2x2x1
jax: 0.10.0
libtpu: 0.0.40
codegen_flags: <defaults>
</compile_context>

<pallas_src>
import functools

import jax
import jax.numpy as jnp
from jax import lax
from jax.experimental import pallas as pl
from jax.experimental.pallas import tpu as pltpu

N_EMBD = 384
BLOCK_SIZE = 128  # max sequence length (tril buffer size in the PyTorch module)
LANE = 128        # TPU lane width; padded per-block width of the fused weight


def _round_up(x, m):
    return (x + m - 1) // m * m


def make_fused_weight(wk, wq, wv):
    """Call once at parameter-init time.

    Returns (C, 3*HP) bf16 with lane-padded blocks [Wk|0 | Wq*C**-0.5|0 | Wv|0],
    where HP = round_up(head_size, 128). The attention scale (C**-0.5, matching the
    PyTorch code which scales by n_embd) is folded into the Q block.
    """
    C, H = wk.shape
    assert wk.shape == wq.shape == wv.shape
    HP = max(LANE, _round_up(H, LANE))
    scale = C ** (-0.5)
    pad = jnp.zeros((C, HP - H), dtype=wk.dtype)
    w = jnp.concatenate([wk, pad, wq * scale, pad, wv, pad], axis=1)  # (C, 3*HP)
    return w.astype(jnp.bfloat16)


def _head_kernel(x_ref, w_ref, o_ref, *, T, HP):
    # x_ref: (T, C)     f32   VMEM  (one batch element; grid axis 0 = batch)
    # w_ref: (C, 3*HP)  bf16  VMEM  (lane-padded [Wk | Wq*scale | Wv], resident)
    # o_ref: (T, HP)    f32   VMEM  (lane-dense padded output)
    x = x_ref[...].astype(jnp.bfloat16)   # in-kernel cast: cheap VPU pass on VMEM data
    w = w_ref[...]

    # Fused QKV projection: one MXU matmul, N = 3*HP, f32 accumulation.
    kqv = jnp.dot(x, w, preferred_element_type=jnp.float32)      # (T, 3*HP) f32
    kqv = kqv.astype(jnp.bfloat16)                               # bf16 operands for MXU

    # 128-lane-aligned slices (no relayout copies).
    k = kqv[:, 0 * HP:1 * HP]                                    # (T, HP)
    q = kqv[:, 1 * HP:2 * HP]                                    # (T, HP), pre-scaled
    v = kqv[:, 2 * HP:3 * HP]                                    # (T, HP)

    # q @ k^T without materializing a transpose: contract trailing HP of both.
    # Padded columns are zero so the extra contraction depth changes nothing.
    scores = lax.dot_general(
        q, k,
        dimension_numbers=(((1,), (1,)), ((), ())),
        preferred_element_type=jnp.float32,
    )                                                            # (T, T) f32

    # Causal mask with a large finite negative (exp underflows to exactly 0).
    row = lax.broadcasted_iota(jnp.int32, (T, T), 0)
    col = lax.broadcasted_iota(jnp.int32, (T, T), 1)
    scores = jnp.where(col > row, jnp.float32(-1e30), scores)

    # Numerically stable softmax in f32; normalization deferred to the output.
    m = jnp.max(scores, axis=-1, keepdims=True)                  # (T, 1)
    e = jnp.exp(scores - m)                                      # (T, T)
    s = jnp.sum(e, axis=-1, keepdims=True)                       # (T, 1)

    # Dropout on attention weights is identity in eval mode.

    pv = jnp.dot(e.astype(jnp.bfloat16), v,
                 preferred_element_type=jnp.float32)             # (T, HP)
    # Lane-dense (HP = multiple of 128) unmasked store.
    o_ref[...] = pv * pl.reciprocal(s, approx=True)


def head_forward(x, w_fused, head_size):
    """x: (B, T, C) f32; w_fused: (C, 3*HP) bf16 from make_fused_weight.

    Returns (B, T, head_size) f32.
    """
    B, T, C = x.shape
    HP = w_fused.shape[1] // 3
    assert w_fused.shape[0] == C
    assert head_size <= HP

    kernel = functools.partial(_head_kernel, T=T, HP=HP)
    out_padded = pl.pallas_call(
        kernel,
        out_shape=jax.ShapeDtypeStruct((B, T, HP), jnp.float32),
        grid=(B,),
        in_specs=[
            # One batch element per grid step (batch-dim squeezed in-kernel).
            pl.BlockSpec((None, T, C), lambda b: (b, 0, 0)),
            # Fused weight resident across the grid (constant block index).
            pl.BlockSpec((C, 3 * HP), lambda b: (0, 0)),
        ],
        out_specs=pl.BlockSpec((None, T, HP), lambda b: (b, 0, 0)),
        compiler_params=pltpu.CompilerParams(
            dimension_semantics=("parallel",)),   # both TCs on v7x; harmless on v5e/v6e
    )(x, w_fused)
    # Drop the zero-padded lanes back to head_size.
    return out_padded[:, :, :head_size]


def reference_head(x, wk, wq, wv):
    """Pure-JAX f32 reference matching the PyTorch forward (eval mode)."""
    B, T, C = x.shape
    k = x @ wk
    q = x @ wq
    v = x @ wv
    wei = jnp.einsum("bth,bsh->bts", q, k) * C ** (-0.5)
    mask = jnp.tril(jnp.ones((T, T), dtype=bool))
    wei = jnp.where(mask, wei, -jnp.inf)
    wei = jax.nn.softmax(wei, axis=-1)
    return jnp.einsum("bts,bsh->bth", wei, v)


if __name__ == "__main__":
    B = 2
    T = BLOCK_SIZE      # 128 (<= block_size, full tril applies)
    C = N_EMBD          # 384
    HEAD_SIZE = 64

    key = jax.random.PRNGKey(0)
    kx, kk, kq, kv = jax.random.split(key, 4)

    x = jax.random.normal(kx, (B, T, C), dtype=jnp.float32)
    # Deterministic init mimicking nn.Linear default scale (U(-1/sqrt(C), 1/sqrt(C))).
    bound = 1.0 / (C ** 0.5)
    wk = jax.random.uniform(kk, (C, HEAD_SIZE), jnp.float32, -bound, bound)
    wq = jax.random.uniform(kq, (C, HEAD_SIZE), jnp.float32, -bound, bound)
    wv = jax.random.uniform(kv, (C, HEAD_SIZE), jnp.float32, -bound, bound)

    # Parameter-init-time fusion (done once, not per call).
    w_fused = jax.block_until_ready(make_fused_weight(wk, wq, wv))

    out = head_forward(x, w_fused, HEAD_SIZE)
    jax.block_until_ready(out)

    ref = reference_head(x, wk, wq, wv)
    assert out.shape == (B, T, HEAD_SIZE)
    # bf16 MXU operands (f32 accumulation) -> relaxed tolerance vs the f32 reference.
    assert jnp.allclose(out, ref, atol=2e-2, rtol=2e-2), "mismatch vs reference"

    print("KERNEL_OK")
</pallas_src>

<mosaic_0001>
module attributes {stable_mosaic.version = 11 : i64} {
  func.func @_head_kernel(%arg0: i32, %arg1: memref<1x128x384xf32, #tpu.memory_space<vmem>>, %arg2: memref<384x384xbf16, #tpu.memory_space<vmem>>, %arg3: memref<1x128x128xf32, #tpu.memory_space<vmem>>) attributes {dimension_semantics = [#tpu.dimension_semantics<parallel>], iteration_bounds = array<i64: 2>, scalar_prefetch = 0 : i64, scratch_operands = 0 : i64, tpu.core_type = #tpu.core_type<tc>, window_params = [{transform_indices = @transform_0, window_bounds = array<i64: 1, 128, 384>}, {pipeline_mode = #tpu.pipeline_mode<synchronous>, transform_indices = @transform_1, window_bounds = array<i64: 384, 384>}, {transform_indices = @transform_2, window_bounds = array<i64: 1, 128, 128>}]} {
    %c0 = arith.constant 0 : index
    %c0_0 = arith.constant 0 : index
    %c0_1 = arith.constant 0 : index
    %0 = vector.load %arg1[%c0, %c0_0, %c0_1] : memref<1x128x384xf32, #tpu.memory_space<vmem>>, vector<1x128x384xf32>
    %1 = vector.shape_cast %0 : vector<1x128x384xf32> to vector<128x384xf32>
    %2 = arith.truncf %1 : vector<128x384xf32> to vector<128x384xbf16>
    %c0_2 = arith.constant 0 : index
    %c0_3 = arith.constant 0 : index
    %3 = vector.load %arg2[%c0_2, %c0_3] : memref<384x384xbf16, #tpu.memory_space<vmem>>, vector<384x384xbf16>
    %cst = arith.constant dense<0.000000e+00> : vector<128x384xf32>
    %4 = tpu.matmul %2, %3, %cst {dimension_numbers = #tpu.dot_dimension_numbers<[1], [0], [0], [1], [0, 0, 1, 1], [], []>} : vector<128x384xbf16>, vector<384x384xbf16>, vector<128x384xf32> -> vector<128x384xf32>
    %5 = arith.truncf %4 : vector<128x384xf32> to vector<128x384xbf16>
    %6 = vector.extract_strided_slice %5 {offsets = [0, 0], sizes = [128, 128], strides = [1, 1]} : vector<128x384xbf16> to vector<128x128xbf16>
    %7 = vector.extract_strided_slice %5 {offsets = [0, 128], sizes = [128, 128], strides = [1, 1]} : vector<128x384xbf16> to vector<128x128xbf16>
    %8 = vector.extract_strided_slice %5 {offsets = [0, 256], sizes = [128, 128], strides = [1, 1]} : vector<128x384xbf16> to vector<128x128xbf16>
    %cst_4 = arith.constant dense<0.000000e+00> : vector<128x128xf32>
    %9 = tpu.matmul %7, %6, %cst_4 {dimension_numbers = #tpu.dot_dimension_numbers<[1], [1], [0], [0], [0, 0, 1, 0], [], []>} : vector<128x128xbf16>, vector<128x128xbf16>, vector<128x128xf32> -> vector<128x128xf32>
    %10 = tpu.iota {dimensions = array<i32: 0>} : vector<128x128xi32>
    %11 = tpu.iota {dimensions = array<i32: 1>} : vector<128x128xi32>
    %12 = arith.cmpi sgt, %11, %10 : vector<128x128xi32>
    %cst_5 = arith.constant -1.000000e+30 : f32
    %13 = vector.broadcast %cst_5 : f32 to vector<128x128xf32>
    %14 = arith.select %12, %13, %9 : vector<128x128xi1>, vector<128x128xf32>
    %cst_6 = arith.constant dense<0xFF800000> : vector<128xf32>
    %15 = vector.multi_reduction <maximumf>, %14, %cst_6 [1] : vector<128x128xf32> to vector<128xf32>
    %16 = vector.shape_cast %15 : vector<128xf32> to vector<128x1xf32>
    %17 = vector.broadcast %16 : vector<128x1xf32> to vector<128x128xf32>
    %18 = arith.subf %14, %17 : vector<128x128xf32>
    %19 = math.exp %18 : vector<128x128xf32>
    %cst_7 = arith.constant dense<0.000000e+00> : vector<128xf32>
    %20 = vector.multi_reduction <add>, %19, %cst_7 [1] : vector<128x128xf32> to vector<128xf32>
    %21 = vector.shape_cast %20 : vector<128xf32> to vector<128x1xf32>
    %22 = arith.truncf %19 : vector<128x128xf32> to vector<128x128xbf16>
    %cst_8 = arith.constant dense<0.000000e+00> : vector<128x128xf32>
    %23 = tpu.matmul %22, %8, %cst_8 {dimension_numbers = #tpu.dot_dimension_numbers<[1], [0], [0], [1], [0, 0, 1, 1], [], []>} : vector<128x128xbf16>, vector<128x128xbf16>, vector<128x128xf32> -> vector<128x128xf32>
    %24 = tpu.reciprocal %21 {approx = true} : vector<128x1xf32> -> vector<128x1xf32>
    %25 = vector.broadcast %24 : vector<128x1xf32> to vector<128x128xf32>
    %26 = arith.mulf %23, %25 : vector<128x128xf32>
    %c0_9 = arith.constant 0 : index
    %c0_10 = arith.constant 0 : index
    %c0_11 = arith.constant 0 : index
    %27 = vector.load %arg3[%c0_9, %c0_10, %c0_11] : memref<1x128x128xf32, #tpu.memory_space<vmem>>, vector<1x128x128xf32>
    %28 = vector.shape_cast %27 : vector<1x128x128xf32> to vector<128x128xf32>
    %29 = vector.shape_cast %26 : vector<128x128xf32> to vector<1x128x128xf32>
    tpu.vector_store %arg3[%c0_9, %c0_10, %c0_11], %29 {strides = array<i32>} : memref<1x128x128xf32, #tpu.memory_space<vmem>>, vector<1x128x128xf32>,
    return
  }
  func.func @transform_0(%arg0: i32) -> (i32, i32, i32) {
    %c0_i32 = arith.constant 0 : i32
    %c0_i32_0 = arith.constant 0 : i32
    %c0_i32_1 = arith.constant 0 : i32
    return %arg0, %c0_i32, %c0_i32_0 : i32, i32, i32
  }
  func.func @transform_1(%arg0: i32) -> (i32, i32) {
    %c0_i32 = arith.constant 0 : i32
    %c0_i32_0 = arith.constant 0 : i32
    %c0_i32_1 = arith.constant 0 : i32
    return %c0_i32, %c0_i32_0 : i32, i32
  }
  func.func @transform_2(%arg0: i32) -> (i32, i32, i32) {
    %c0_i32 = arith.constant 0 : i32
    %c0_i32_0 = arith.constant 0 : i32
    %c0_i32_1 = arith.constant 0 : i32
    return %arg0, %c0_i32, %c0_i32_0 : i32, i32, i32
  }
}

</mosaic_0001>

<bundles_post_ra>
// kernel: tpu_custom_call.1
= control target key start
LH: loop header
LB: loop body
LE: loop exit
PB: predicated region body
PF: predicated region fallthrough
CT: control target
= control target key end

     0   :  { %7 = vsyncpa [#allocation3], 0  ;;  %s2914_s0 = inlined_call_operand.hbm [shape: f32[2,128,384], index: 0, kind: input, shape index: {}]   ;;  %s2915_s1 = inlined_call_operand.hbm [shape: bf16[384,384], index: 1, kind: input, shape index: {}]   ;;  %s2916_s2 = inlined_call_operand.hbm [shape: f32[2,128,128], index: 2, kind: output, shape index: {}]  }
   0x1   :  { %9 = vsyncpa [#allocation3 + $0x1], 0 }
   0x2   :  { %10 = vsyncpa [#allocation6], 0 }
   0x3   :  { %11 = vsyncpa [#allocation4], 0 }
   0x4   :  { %13 = vsyncpa [#allocation4 + $0x1], 0  ;;  %s2408_s9 = smov 0   ;;  %s2410_s10 = smov 0  }
   0x5   :  { %s2412_s11 = smov 0   ;;  %s2414_s12 = smov 0  }
   0x6 LB: > { %s2429_s13 = sadd.s32 4294967295, %s2381_s12   ;;  %s1684_s14 = sadd.s32 4294967294, %s2381_s12   ;;  %s2381_s12 = sphi %s2414_s12, %s2936_s12   ;;  %s2377_s11 = sphi %s2412_s11, %s2935_s11   ;;  %s2373_s10 = sphi %s2410_s10, %s2934_s10   ;;  %s2369_s9 = sphi %s2408_s9, %s2933_s9  }
   0x7   : > { %p39_p0 = scmp.ne.s32.totalorder %s2373_s10, %s2369_s9  ;;  %p2917_p1 = scmp.eq.s32.totalorder %s2429_s13, 0 }
   0x8   : > { %p90_p3 = scmp.eq.s32.totalorder %s1684_s14, 1  ;;  %p1685_p5 = scmp.ge.s32.totalorder %s2381_s12, 1 }
   0x9   : > { %p2438_p4 = por %p2917_p1, %p39_p0  ;;  %p97_p7 = scmp.lt.s32.totalorder %s2381_s12, 3 }
   0xa   : > { %p2443_p6 = por %p90_p3, %p39_p0  ;;  %s2383_s18 = smov [#allocation5]  }
   0xb   : > { %s2920_s15 = scalar_select %p2438_p4, 1, 0 }
   0xc   : > { %s2921_s16 = scalar_select %p2443_p6, 1, 0 }
   0xd   : > { %p2448_p8 = pnand %p1685_p5, %p97_p7  ;;  %s109_s19 = sshll.u32 %s2383_s18, 4  ;;  %s2452_s19 = int_to_ptr.vmem [resolvable:$true] %s109_s19 }
   0xe   : > { %s2464_s21 = sadd.s32 1, %s2381_s12   ;;  %s26_s22 = sadd.s32 1, %s2377_s11 }
   0xf   : > { %s2922_s17 = scalar_select %p2448_p8, 1, 0 }
  0x10   : > { %p2037_p9 = pneg %p2448_p8  ;;  %s23_s23 = ssub.s32 %s2381_s12, %s2464_s21 }
  0x11   : > { %s2253_s26 = scalar_lea.hbm %s2915_s1, 9216 }
  0x12   : > { %p2459_p11 = pnand %p2037_p9, %p2917_p1  ;;  %p2254_p12 = scmp.ne.s32.totalorder %s2915_s1, %s2253_s26 }
  0x13   : > { %p2260_p5 = scmp.lt.u32.totalorder %s2253_s26, %s2915_s1 }
  0x14   : > { %p2255_p13 = pneg %p2459_p11 }
  0x16   : > { %p2256_p0 = pnand %p2255_p13, %p2254_p12 }
  0x18   : > { %p2257_p3 = pneg %p2256_p0 }
  0x1a   : > { %p2262_p7 = pnand %p2260_p5, %p2257_p3 }
  0x1c   : > { %2265 = shalt.err (!%p2262_p7)
}
  0x1d   : > { %s2266_s3 = scalar_lea.vmem %s2452_s19, 9216  ;;  %p2274_p2 = scmp.lt.s32.totalorder %s2452_s19, %s2452_s19 }
  0x1e   : > { %p2267_p9 = scmp.ne.s32.totalorder %s2452_s19, %s2266_s3  ;;  %p2275_p6 = scmp.lt.s32.totalorder %s2266_s3, %s2266_s3 }
  0x20   : > { %p2269_p10 = pnand %p2267_p9, %p2255_p13  ;;  %p2276_p4 = por %p2275_p6, %p2274_p2 }
  0x22   : > { %p2270_p1 = pneg %p2269_p10 }
  0x24   : > { %p2277_p8 = pnand %p2276_p4, %p2270_p1 }
  0x26   : > { %2280 = shalt.err (!%p2277_p8)
}
  0x27   : > { %s2384_s4 = smov 192   ;;  %s2385_s5 = smov 12  }
  0x28   : > { %2040 = dma.hbm_to_vmem [thread:$0]  (!%p2459_p11), %s2915_s1, 9216, %s2452_s19, [#allocation6], %s2384_s4, %s2384_s4, %s2385_s5  }
  0x29   : > { %p24_p2 = scmp.eq.s32.totalorder %s23_s23, 0  ;;  %p33_p1 = scmp.ne.s32.totalorder %s2377_s11, %s2373_s10 }
  0x2a   : > { %p34_p4 = scmp.eq.s32.totalorder %s2381_s12, 0  ;;  %p2050_p6 = scmp.lt.s32.totalorder %s2381_s12, 2 }
  0x2b   : > { %s2495_s8 = scalar_select %p24_p2, %s2377_s11, %s26_s22  }
  0x2c   : > { %p35_p8 = por %p34_p4, %p33_p1  ;;  %p2924_p10 = scmp.eq.s32.totalorder %s2429_s13, 1 }
  0x2d   : > { %s123_s18 = sand.u32 1, %s2377_s11   ;;  %s2027_s24 = smul.u32 6144, %s2381_s12 }
  0x2e   : > { %p2499_p12 = por %p2924_p10, %p33_p1  ;;  %s2026_s25 = smul.u32 384, %s123_s18 }
  0x2f   : > { %s2508_s27 = scalar_lea.hbm %s2914_s0, %s2027_s24  ;;  %p2510_p11 = pnand %p2050_p6, %p35_p8 }
  0x30   : > { %s127_s22 = scalar_lea.vmem [#allocation2], %s2026_s25  ;;  %s2516_s28 = scalar_lea.sflag [#allocation3], %s123_s18 }
  0x31   : > { %s134_s23 = sshll.u32 %s127_s22, 4  ;;  %s2281_s29 = scalar_lea.hbm %s2508_s27, 6144  ;;  %s2514_s23 = int_to_ptr.vmem [resolvable:$true] %s134_s23 }
  0x32   : > { %p2282_p13 = scmp.ne.s32.totalorder %s2508_s27, %s2281_s29  ;;  %p2283_p0 = pneg %p2510_p11 }
  0x33   : > { %s2286_s4 = scalar_lea.hbm %s2914_s0, 12288  ;;  %p2287_p7 = scmp.lt.u32.totalorder %s2508_s27, %s2914_s0 }
  0x34   : > { %p2284_p3 = pnand %p2283_p0, %p2282_p13  ;;  %p2288_p9 = scmp.lt.u32.totalorder %s2286_s4, %s2281_s29 }
  0x35   : > { %p2290_p1 = scmp.lt.u32.totalorder %s2281_s29, %s2508_s27 }
  0x36   : > { %p2285_p5 = pneg %p2284_p3  ;;  %p2289_p2 = por %p2288_p9, %p2287_p7 }
  0x38   : > { %p2291_p4 = por %p2290_p1, %p2289_p2 }
  0x3a   : > { %p2292_p6 = pnand %p2291_p4, %p2285_p5 }
  0x3c   : > { %2295 = shalt.err (!%p2292_p6)
}
  0x3d   : > { %s2296_s7 = scalar_lea.vmem %s2514_s23, 6144  ;;  %s2386_s18 = smov [#allocation2]  }
  0x3e   : > { %p2297_p8 = scmp.ne.s32.totalorder %s2514_s23, %s2296_s7  ;;  %s2301_s24 = sshll.u32 %s2386_s18, 4  ;;  %s2302_s24 = int_to_ptr.vmem [resolvable:$false] %s2301_s24 }
  0x3f   : > { %s2303_s25 = scalar_lea.vmem %s2302_s24, 12288  ;;  %p2304_p3 = scmp.lt.s32.totalorder %s2514_s23, %s2302_s24 }
  0x40   : > { %p2299_p10 = pnand %p2297_p8, %p2283_p0  ;;  %p2305_p7 = scmp.lt.s32.totalorder %s2303_s25, %s2296_s7 }
  0x42   : > { %p2300_p13 = pneg %p2299_p10  ;;  %p2306_p9 = por %p2305_p7, %p2304_p3 }
  0x44   : > { %p2307_p2 = pnand %p2306_p9, %p2300_p13 }
  0x46   : > { %2310 = shalt.err (!%p2307_p2)
}
  0x47   : > { %s2387_s20 = smov 384   ;;  %s2388_s26 = smov 24  }
  0x48   : > { %2044 = dma.hbm_to_vmem [thread:$0]  (!%p2510_p11), %s2508_s27, 6144, %s2514_s23, %s2516_s28, %s2387_s20, %s2387_s20, %s2388_s26  }
  0x49   : > { %p2927_p0 = scmp.ne.s32.totalorder %s2922_s17, 0 }
  0x4a   : > { %s2547_s22 = sand.u32 (!%p2927_p0), 1, %s2373_s10   ;;  %p2928_p5 = scmp.ne.s32.totalorder (!%p2927_p0), %s2920_s15, 0 }
  0x4b   : > { %146 = sbr.rel (%p2927_p0) target bundleno = 1136 (0x470), region = 28  ;;  %s149_s30 = scalar_lea.sflag (!%p2927_p0), [#allocation3], %s2547_s22 }
  0x4c   : > { %s2028_s29 = smul.u32 (!%p2927_p0), 384, %s2547_s22 }
  0x4e   : > { %s2551_s3 = scalar_lea.vmem (!%p2927_p0), [#allocation2], %s2028_s29 }
  0x52   : > { %2356 = dma.done.wait (%p2928_p5), %s149_s30, 6144  }
  0x53   : > { %2358 = vsyncadd (%p2928_p5), %s149_s30, 4294961152  ;;  %p2929_p11 = scmp.eq.s32.totalorder %s2429_s13, 0 }
  0x55   : > { %2360 = dma.done.wait (%p2929_p11), [#allocation6], 9216   ;;  %p2930_p1 = pmov %p2929_p11 }
  0x56   : > { %v2093_v0 = vld [vmem:[#allocation5 + $0x4] ss:$12 sps:$4 sm:$0xff]   ;;  %v2095_v1 = vld [vmem:[#allocation5] ss:$12 sps:$4 sm:$0xff]   ;;  %v2096_v2 = vld [vmem:[#allocation5 + $0x1c] ss:$12 sps:$4 sm:$0xff]  }
  0x57   : > { %2362 = vsyncadd (%p2930_p1), [#allocation6], 4294958080  ;;  %730 = vmatprep.subr.bf16.mxu0 %v2093_v0  ;;  %v2098_v3 = vld [vmem:[#allocation5 + $0x18] ss:$12 sps:$4 sm:$0xff]   ;;  %v2099_v4 = vld [vmem:[#allocation5 + $0x34] ss:$12 sps:$4 sm:$0xff]  }
  0x58   : > { %731 = vmatpush1.bf16.msra.mxu0 %v2095_v1  ;;  %v2101_v5 = vld [vmem:[#allocation5 + $0x30] ss:$12 sps:$4 sm:$0xff]   ;;  %v2102_v6 = vld [vmem:[#allocation5 + $0x4c] ss:$12 sps:$4 sm:$0xff]   ;;  %v2104_v7 = vld [vmem:[#allocation5 + $0x48] ss:$12 sps:$4 sm:$0xff]  }
  0x59   : > { %732 = vmatprep.subr.bf16.mxu0 %v2096_v2  ;;  %v2105_v8 = vld [vmem:[#allocation5 + $0x64] ss:$12 sps:$4 sm:$0xff]   ;;  %v2107_v9 = vld [vmem:[#allocation5 + $0x60] ss:$12 sps:$4 sm:$0xff]   ;;  %v2108_v10 = vld [vmem:[#allocation5 + $0x7c] ss:$12 sps:$4 sm:$0xff]  }
  0x5a   : > { %v2110_v11 = vld [vmem:[#allocation5 + $0x78] ss:$12 sps:$4 sm:$0xff]   ;;  %v2111_v12 = vld [vmem:[#allocation5 + $0x94] ss:$12 sps:$4 sm:$0xff]   ;;  %v179_v13 = vld [vmem:[%s2551_s3 + $0x8] sm:$0xff]  ;;  %s1691_s15 = sshll.u32 %s2547_s22, 7 }
  0x5b   : > { %v182_v14 = vld [vmem:[%s2551_s3 + $0x20] sm:$0xff]  ;;  %v2113_v16 = vld [vmem:[#allocation5 + $0x90] ss:$12 sps:$4 sm:$0xff]   ;;  %v2114_v17 = vld [vmem:[#allocation5 + $0xac] ss:$12 sps:$4 sm:$0xff]   ;;  %s2845_s17 = scalar_lea.vmem [#allocation7], %s1691_s15 }
  0x5c   : > { %733 = vmatpush1.bf16.msra.mxu0 %v2098_v3  ;;  %v227_v15 = vpack.c.bf16 %v182_v14, %v179_v13  ;;  %v2116_v18 = vld [vmem:[#allocation5 + $0xa8] ss:$12 sps:$4 sm:$0xff]   ;;  %v2117_v19 = vld [vmem:[#allocation5 + $0xc4] ss:$12 sps:$4 sm:$0xff]   ;;  %v2119_v20 = vld [vmem:[#allocation5 + $0xc0] ss:$12 sps:$4 sm:$0xff]  }
  0x5d   : > { %734 = vmatprep.subr.bf16.mxu0 %v2099_v4  ;;  %v2120_v21 = vld [vmem:[#allocation5 + $0xdc] ss:$12 sps:$4 sm:$0xff]   ;;  %v2122_v22 = vld [vmem:[#allocation5 + $0xd8] ss:$12 sps:$4 sm:$0xff]   ;;  %v2123_v23 = vld [vmem:[#allocation5 + $0xf4] ss:$12 sps:$4 sm:$0xff]  }
  0x5e   : > { %762 = vmatprep.mubr.bf16.mxu0 %v227_v15  ;;  %988 = vmatprep.mubr.bf16.mxu1 %v227_v15  ;;  %v2125_v24 = vld [vmem:[#allocation5 + $0xf0] ss:$12 sps:$4 sm:$0xff]   ;;  %v2126_v25 = vld [vmem:[#allocation5 + $0x10c] ss:$12 sps:$4 sm:$0xff]   ;;  %v2128_v26 = vld [vmem:[#allocation5 + $0x108] ss:$12 sps:$4 sm:$0xff]  }
  0x5f   : > { %v2129_v27 = vld [vmem:[#allocation5 + $0x124] ss:$12 sps:$4 sm:$0xff]   ;;  %v2131_v28 = vld [vmem:[#allocation5 + $0x120] ss:$12 sps:$4 sm:$0xff]   ;;  %v2132_v29 = vld [vmem:[#allocation5 + $0x13c] ss:$12 sps:$4 sm:$0xff]  }
  0x60   : > { %735 = vmatpush1.bf16.msra.mxu0 %v2101_v5  ;;  %v2134_v30 = vld [vmem:[#allocation5 + $0x138] ss:$12 sps:$4 sm:$0xff]   ;;  %v2135_v31 = vld [vmem:[#allocation5 + $0x154] ss:$12 sps:$4 sm:$0xff]   ;;  %v2137_v32 = vld [vmem:[#allocation5 + $0x150] ss:$12 sps:$4 sm:$0xff]  }
  0x61   : > { %736 = vmatprep.subr.bf16.mxu0 %v2102_v6  ;;  %v2138_v33 = vld [vmem:[#allocation5 + $0x16c] ss:$12 sps:$4 sm:$0xff]   ;;  %v2165_v34 = vld [vmem:[#allocation5 + $0xc8] ss:$12 sps:$4 sm:$0xff]   ;;  %v178_v39 = vld [vmem:[%s2551_s3] sm:$0xff]  ;;  %s1769_s27 = sshll.u32 %s2429_s13, 11 }
  0x62   : > { %v2166_v35 = vld [vmem:[#allocation5 + $0x8] ss:$12 sps:$4 sm:$0xff]   ;;  %1770 = vmatprep.subr.bf16.mxu1 %v2165_v34  ;;  %v2167_v37 = vld [vmem:[#allocation5 + $0xe0] ss:$12 sps:$4 sm:$0xff]   ;;  %v181_v40 = vld [vmem:[%s2551_s3 + $0x18] sm:$0xff]  ;;  %s1601_s19 = sshll.u32 %s2845_s17, 4  ;;  %s2865_s4 = scalar_lea.hbm %s2916_s2, %s1769_s27  ;;  %s2867_s19 = int_to_ptr.vmem [resolvable:$true] %s1601_s19 }
  0x63   : > { %v2140_v36 = vld [vmem:[#allocation5 + $0x168] ss:$12 sps:$4 sm:$0xff]   ;;  %1771 = vmatpush3.bf16.msra.mxu1 %v2166_v35  ;;  %v2168_v38 = vld [vmem:[#allocation5 + $0x20] ss:$12 sps:$4 sm:$0xff]   ;;  %v2169_v41 = vld [vmem:[#allocation5 + $0xf8] ss:$12 sps:$4 sm:$0xff]   ;;  %v2567_v46 = vpack.c.bf16 %v181_v40, %v178_v39 }
  0x64   : > { %737 = vmatpush1.bf16.msra.mxu0 %v2104_v7  ;;  %v2143_v42 = vld [vmem:[#allocation5 + $0x184] ss:$12 sps:$4 sm:$0xff]   ;;  %v185_v43 = vld [vmem:[%s2551_s3 + $0x38] sm:$0xff]  ;;  %1772 = vmatprep.subr.bf16.mxu1 %v2167_v37  ;;  %v2141_v45 = vld [vmem:[#allocation5 + $0x180] ss:$12 sps:$4 sm:$0xff]   ;;  %s1588_s13 = scalar_lea.sflag [#allocation4], %s2547_s22 }
  0x65   : > { %738 = vmatprep.subr.bf16.mxu0 %v2105_v8  ;;  %v188_v44 = vld [vmem:[%s2551_s3 + $0x50] sm:$0xff]  ;;  %v2170_v47 = vld [vmem:[#allocation5 + $0x38] ss:$12 sps:$4 sm:$0xff]   ;;  %v2146_v49 = vld [vmem:[#allocation5 + $0x19c] ss:$12 sps:$4 sm:$0xff]   ;;  %s2311_s5 = scalar_lea.vmem %s2867_s19, 2048 }
  0x66   : > { %v2569_v48 = vpack.c.bf16 %v188_v44, %v185_v43  ;;  %v2171_v50 = vld [vmem:[#allocation5 + $0x110] ss:$12 sps:$4 sm:$0xff]   ;;  %v187_v52 = vld [vmem:[%s2551_s3 + $0x48] sm:$0xff]  ;;  %v2144_v53 = vld [vmem:[#allocation5 + $0x198] ss:$12 sps:$4 sm:$0xff]   ;;  %p2312_p4 = scmp.ne.s32.totalorder %s2867_s19, %s2311_s5  ;;  %s2390_s6 = smov [#allocation7]  }
  0x67   : > { %1773 = vmatpush3.bf16.msra.mxu1 %v2168_v38  ;;  %v184_v51 = vld [vmem:[%s2551_s3 + $0x30] sm:$0xff]  ;;  %v191_v54 = vld [vmem:[%s2551_s3 + $0x68] sm:$0xff]  ;;  %v194_v55 = vld [vmem:[%s2551_s3 + $0x80] sm:$0xff]  ;;  %s2315_s7 = sshll.u32 %s2390_s6, 4  ;;  %s2316_s7 = int_to_ptr.vmem [resolvable:$false] %s2315_s7 }
  0x68   : > { %739 = vmatpush1.bf16.msra.mxu0 %v2107_v9  ;;  %1774 = vmatprep.subr.bf16.mxu1 %v2169_v41  ;;  %v2172_v56 = vld [vmem:[#allocation5 + $0x50] ss:$12 sps:$4 sm:$0xff]   ;;  %v2173_v57 = vld [vmem:[#allocation5 + $0x128] ss:$12 sps:$4 sm:$0xff]   ;;  %v2577_v59 = vpack.c.bf16 %v187_v52, %v184_v51  ;;  %v2579_v61 = vpack.c.bf16 %v194_v55, %v191_v54  ;;  %v2152_v63 = vld [vmem:[#allocation5 + $0x1cc] ss:$12 sps:$4 sm:$0xff]   ;;  %p2313_p6 = pnand %p2312_p4, %p2499_p12  ;;  %p2318_p10 = scmp.lt.s32.totalorder %s2867_s19, %s2316_s7 }
  0x69   : > { %740 = vmatprep.subr.bf16.mxu0 %v2108_v10  ;;  %v2149_v58 = vld [vmem:[#allocation5 + $0x1b4] ss:$12 sps:$4 sm:$0xff]   ;;  %v2147_v62 = vld [vmem:[#allocation5 + $0x1b0] ss:$12 sps:$4 sm:$0xff]   ;;  %v2177_v5 = vld [vmem:[#allocation5 + $0x158] ss:$12 sps:$4 sm:$0xff]  }
  0x6a   : > { %v2174_v60 = vld [vmem:[#allocation5 + $0x68] ss:$12 sps:$4 sm:$0xff]   ;;  %v2175_v0 = vld [vmem:[#allocation5 + $0x140] ss:$12 sps:$4 sm:$0xff]   ;;  %v193_v3 = vld [vmem:[%s2551_s3 + $0x78] sm:$0xff]  ;;  %p2314_p8 = pneg %p2313_p6  ;;  %s2317_s18 = scalar_lea.vmem %s2316_s7, 4096 }
  0x6b   : > { %1775 = vmatpush3.bf16.msra.mxu1 %v2170_v47  ;;  %v190_v1 = vld [vmem:[%s2551_s3 + $0x60] sm:$0xff]  ;;  %v2150_v4 = vld [vmem:[#allocation5 + $0x1c8] ss:$12 sps:$4 sm:$0xff]   ;;  %v197_v6 = vld [vmem:[%s2551_s3 + $0x98] sm:$0xff]  ;;  %p2319_p13 = scmp.lt.s32.totalorder %s2317_s18, %s2311_s5 }
  0x6c   : > { %741 = vmatpush1.bf16.msra.mxu0 %v2110_v11  ;;  %1776 = vmatprep.subr.bf16.mxu1 %v2171_v50  ;;  %v2176_v2 = vld [vmem:[#allocation5 + $0x80] ss:$12 sps:$4 sm:$0xff]   ;;  %v200_v7 = vld [vmem:[%s2551_s3 + $0xb0] sm:$0xff]  ;;  %v2587_v9 = vpack.c.bf16 %v193_v3, %v190_v1  ;;  %v2178_v10 = vld [vmem:[#allocation5 + $0x98] ss:$12 sps:$4 sm:$0xff]  }
  0x6d   : > { %742 = vmatprep.subr.bf16.mxu0 %v2111_v12  ;;  %v2155_v8 = vld [vmem:[#allocation5 + $0x1e4] ss:$12 sps:$4 sm:$0xff]   ;;  %v2589_v11 = vpack.c.bf16 %v200_v7, %v197_v6  ;;  %v2153_v12 = vld [vmem:[#allocation5 + $0x1e0] ss:$12 sps:$4 sm:$0xff]   ;;  %v2158_v13 = vld [vmem:[#allocation5 + $0x1fc] ss:$12 sps:$4 sm:$0xff]   ;;  %p2320_p3 = por %p2319_p13, %p2318_p10 }
  0x6e   : > { %v2179_v14 = vld [vmem:[#allocation5 + $0x170] ss:$12 sps:$4 sm:$0xff]   ;;  %v211_v38 = vld [vmem:[%s2551_s3 + $0x108] sm:$0xff]  ;;  %v218_v40 = vld [vmem:[%s2551_s3 + $0x140] sm:$0xff] }
  0x6f   : > { %1777 = vmatpush3.bf16.msra.mxu1 %v2172_v56  ;;  %v196_v15 = vld [vmem:[%s2551_s3 + $0x90] sm:$0xff]  ;;  %v215_v39 = vld [vmem:[%s2551_s3 + $0x128] sm:$0xff]  ;;  %v221_v47 = vld [vmem:[%s2551_s3 + $0x158] sm:$0xff]  ;;  %v2389_v56 = vmov 0   ;;  %p2321_p7 = pnand %p2320_p3, %p2314_p8 }
  0x70   : > { %743 = vmatpush1.bf16.msra.mxu0 %v2113_v16  ;;  %1778 = vmatprep.subr.bf16.mxu1 %v2173_v57  ;;  %v2180_v16 = vld [vmem:[#allocation5 + $0xb0] ss:$12 sps:$4 sm:$0xff]   ;;  %v2185_v41 = vld [vmem:[#allocation5 + $0x1e8] ss:$12 sps:$4 sm:$0xff]   ;;  %v245_v43 = vpack.c.bf16 %v218_v40, %v215_v39  ;;  %v2186_v44 = vld [vmem:[#allocation5 + $0x200] ss:$12 sps:$4 sm:$0xff]  }
  0x71   : > { %744 = vmatprep.subr.bf16.mxu0 %v2114_v17  ;;  %v199_v17 = vld [vmem:[%s2551_s3 + $0xa8] sm:$0xff]  ;;  %v208_v37 = vld [vmem:[%s2551_s3 + $0xf0] sm:$0xff]  ;;  %v201_v3 = vld [vmem:[%s2551_s3 + $0xb8] sm:$0xff] }
  0x72   : > { %v2188_v52 = vld [vmem:[#allocation5 + $0x230] ss:$12 sps:$4 sm:$0xff]   ;;  %v223_v54 = vld [vmem:[%s2551_s3 + $0x168] sm:$0xff] }
  0x73   : > { %1779 = vmatpush3.bf16.msra.mxu1 %v2174_v60  ;;  %v180_v57 = vld [vmem:[%s2551_s3 + $0x10] sm:$0xff]  ;;  %v186_v60 = vld [vmem:[%s2551_s3 + $0x40] sm:$0xff]  ;;  %v207_v6 = vld [vmem:[%s2551_s3 + $0xe8] sm:$0xff] }
  0x74   : > { %745 = vmatpush1.bf16.msra.mxu0 %v2116_v18  ;;  %1780 = vmatprep.subr.bf16.mxu1 %v2175_v0  ;;  %v2156_v18 = vld [vmem:[#allocation5 + $0x1f8] ss:$12 sps:$4 sm:$0xff]   ;;  %v195_v0 = vld [vmem:[%s2551_s3 + $0x88] sm:$0xff] }
  0x75   : > { %746 = vmatprep.subr.bf16.mxu0 %v2117_v19  ;;  %v2181_v19 = vld [vmem:[#allocation5 + $0x188] ss:$12 sps:$4 sm:$0xff]  }
  0x77   : > { %1781 = vmatpush3.bf16.msra.mxu1 %v2176_v2  ;;  %v198_v2 = vld [vmem:[%s2551_s3 + $0xa0] sm:$0xff] }
  0x78   : > { %747 = vmatpush1.bf16.msra.mxu0 %v2119_v20  ;;  %1782 = vmatprep.subr.bf16.mxu1 %v2177_v5  ;;  %v203_v20 = vld [vmem:[%s2551_s3 + $0xc8] sm:$0xff]  ;;  %v204_v5 = vld [vmem:[%s2551_s3 + $0xd0] sm:$0xff] }
  0x79   : > { %748 = vmatprep.subr.bf16.mxu0 %v2120_v21  ;;  %v206_v21 = vld [vmem:[%s2551_s3 + $0xe0] sm:$0xff]  ;;  %v240_v7 = vpack.c.bf16 %v207_v6, %v204_v5 }
  0x7b   : > { %1783 = vmatpush3.bf16.msra.mxu1 %v2178_v10  ;;  %v216_v10 = vld [vmem:[%s2551_s3 + $0x130] sm:$0xff] }
  0x7c   : > { %749 = vmatpush1.bf16.msra.mxu0 %v2122_v22  ;;  %v2161_v22 = vld [vmem:[#allocation5 + $0x214] ss:$12 sps:$4 sm:$0xff]   ;;  %1784 = vmatprep.subr.bf16.mxu1 %v2179_v14 }
  0x7d   : > { %750 = vmatprep.subr.bf16.mxu0 %v2123_v23  ;;  %v235_v23 = vpack.c.bf16 %v199_v17, %v196_v15  ;;  %v222_v14 = vld [vmem:[%s2551_s3 + $0x160] sm:$0xff]  ;;  %v225_v15 = vld [vmem:[%s2551_s3 + $0x178] sm:$0xff] }
  0x7f   : > { %1785 = vmatpush3.bf16.msra.mxu1 %v2180_v16  ;;  %v249_v16 = vpack.c.bf16 %v225_v15, %v222_v14 }
  0x80   : > { %751 = vmatpush1.bf16.msra.mxu0 %v2125_v24  ;;  %v239_v24 = vpack.c.bf16 %v206_v21, %v203_v20  ;;  %1882 = vmatprep.subr.bf16.mxu1 %v2181_v19 }
  0x81   : > { %752 = vmatprep.subr.bf16.mxu0 %v2126_v25  ;;  %v2159_v25 = vld [vmem:[#allocation5 + $0x210] ss:$12 sps:$4 sm:$0xff]  }
  0x82   : > { %989 = vmatmul.mubr.bf16.vlgmr.msra.gmra.mrb[0].mxu1 %v2567_v46 }
  0x83   : > { %996 = vmatprep.mubr.bf16.mxu1 %v2569_v48  ;;  %1883 = vmatpush3.bf16.msra.mxu1 %v2181_v19 }
  0x84   : > { %753 = vmatpush1.bf16.msra.mxu0 %v2128_v26  ;;  %v2164_v26 = vld [vmem:[#allocation5 + $0x22c] ss:$12 sps:$4 sm:$0xff]  }
  0x85   : > { %754 = vmatprep.subr.bf16.mxu0 %v2129_v27  ;;  %v2182_v27 = vld [vmem:[#allocation5 + $0x1a0] ss:$12 sps:$4 sm:$0xff]  }
  0x86   : > { %1884 = vmatprep.subr.bf16.mxu1 %v2182_v27 }
  0x87   : > { %1885 = vmatpush3.bf16.msra.mxu1 %v2182_v27 }
  0x88   : > { %755 = vmatpush1.bf16.msra.mxu0 %v2131_v28  ;;  %v202_v28 = vld [vmem:[%s2551_s3 + $0xc0] sm:$0xff] }
  0x89   : > { %756 = vmatprep.subr.bf16.mxu0 %v2132_v29  ;;  %v205_v29 = vld [vmem:[%s2551_s3 + $0xd8] sm:$0xff] }
  0x8a   : > { %v238_v34 = vpack.c.bf16 %v205_v29, %v202_v28  ;;  %997 = vmatmul.mubr.bf16.gmra.mrb[4].mxu1 %v2577_v59 }
  0x8b   : > { %1004 = vmatprep.mubr.bf16.mxu1 %v2579_v61 }
  0x8c   : > { %757 = vmatpush1.bf16.msra.mxu0 %v2134_v30  ;;  %v2162_v30 = vld [vmem:[#allocation5 + $0x228] ss:$12 sps:$4 sm:$0xff]  }
  0x8d   : > { %758 = vmatprep.subr.bf16.mxu0 %v2135_v31  ;;  %v209_v31 = vld [vmem:[%s2551_s3 + $0xf8] sm:$0xff] }
  0x90   : > { %759 = vmatpush1.bf16.msra.mxu0 %v2137_v32  ;;  %v212_v32 = vld [vmem:[%s2551_s3 + $0x110] sm:$0xff] }
  0x91   : > { %760 = vmatprep.subr.bf16.mxu0 %v2138_v33  ;;  %v2183_v33 = vld [vmem:[#allocation5 + $0x1b8] ss:$12 sps:$4 sm:$0xff]   ;;  %v242_v35 = vpack.c.bf16 %v212_v32, %v209_v31 }
  0x92   : > { %1886 = vmatprep.subr.bf16.mxu1 %v2183_v33  ;;  %1005 = vmatmul.mubr.bf16.gmra.mrb[8].mxu1 %v2587_v9 }
  0x93   : > { %1887 = vmatpush3.bf16.msra.mxu1 %v2183_v33  ;;  %1012 = vmatprep.mubr.bf16.mxu1 %v2589_v11 }
  0x94   : > { %761 = vmatpush1.bf16.msra.mxu0 %v2140_v36  ;;  %v2184_v36 = vld [vmem:[#allocation5 + $0x1d0] ss:$12 sps:$4 sm:$0xff]  }
  0x95   : > { %843 = vmatprep.subr.bf16.mxu0 %v2143_v42  ;;  %1888 = vmatprep.subr.bf16.mxu1 %v2184_v36  ;;  %v241_v42 = vpack.c.bf16 %v211_v38, %v208_v37 }
  0x97   : > { %763 = vmatmul.mubr.bf16.vlgmr.msra.gmra.mrb[0].mxu0 %v2567_v46  ;;  %1889 = vmatpush3.bf16.msra.mxu1 %v2184_v36  ;;  %v217_v46 = vld [vmem:[%s2551_s3 + $0x138] sm:$0xff] }
  0x98   : > { %844 = vmatpush1.bf16.msra.mxu0 %v2141_v45  ;;  %772 = vmatprep.mubr.bf16.mxu0 %v2569_v48  ;;  %v214_v45 = vld [vmem:[%s2551_s3 + $0x120] sm:$0xff]  ;;  %v224_v48 = vld [vmem:[%s2551_s3 + $0x170] sm:$0xff] }
  0x99   : > { %845 = vmatprep.subr.bf16.mxu0 %v2146_v49  ;;  %1890 = vmatprep.subr.bf16.mxu1 %v2185_v41  ;;  %v2187_v49 = vld [vmem:[#allocation5 + $0x218] ss:$12 sps:$4 sm:$0xff]   ;;  %v244_v50 = vpack.c.bf16 %v217_v46, %v214_v45  ;;  %v248_v51 = vpack.c.bf16 %v224_v48, %v221_v47 }
  0x9a   : > { %1013 = vmatmul.mubr.bf16.gmra.mrb[12].mxu1 %v235_v23 }
  0x9b   : > { %1891 = vmatpush3.bf16.msra.mxu1 %v2185_v41  ;;  %1020 = vmatprep.mubr.bf16.mxu1 %v239_v24 }
  0x9c   : > { %846 = vmatpush1.bf16.msra.mxu0 %v2144_v53  ;;  %1892 = vmatprep.subr.bf16.mxu1 %v2186_v44  ;;  %v220_v53 = vld [vmem:[%s2551_s3 + $0x150] sm:$0xff] }
  0x9d   : > { %847 = vmatprep.subr.bf16.mxu0 %v2149_v58  ;;  %v247_v55 = vpack.c.bf16 %v223_v54, %v220_v53  ;;  %v183_v58 = vld [vmem:[%s2551_s3 + $0x28] sm:$0xff] }
  0x9f   : > { %773 = vmatmul.mubr.bf16.gmra.mrb[4].mxu0 %v2577_v59  ;;  %1893 = vmatpush3.bf16.msra.mxu1 %v2186_v44  ;;  %v228_v59 = vpack.c.bf16 %v183_v58, %v180_v57 }
  0xa0   : > { %782 = vmatprep.mubr.bf16.mxu0 %v2579_v61  ;;  %848 = vmatpush1.bf16.msra.mxu0 %v2147_v62  ;;  %v189_v61 = vld [vmem:[%s2551_s3 + $0x58] sm:$0xff] }
  0xa1   : > { %849 = vmatprep.subr.bf16.mxu0 %v2152_v63  ;;  %1894 = vmatprep.subr.bf16.mxu1 %v2187_v49  ;;  %v231_v62 = vpack.c.bf16 %v189_v61, %v186_v60  ;;  %v192_v63 = vld [vmem:[%s2551_s3 + $0x70] sm:$0xff] }
  0xa2   : > { %1021 = vmatmul.mubr.bf16.gmra.mrb[16].mxu1 %v238_v34  ;;  %v234_v1 = vpack.c.bf16 %v195_v0, %v192_v63 }
  0xa3   : > { %1895 = vmatpush3.bf16.msra.mxu1 %v2187_v49  ;;  %1028 = vmatprep.mubr.bf16.mxu1 %v242_v35 }
  0xa4   : > { %850 = vmatpush1.bf16.msra.mxu0 %v2150_v4  ;;  %1896 = vmatprep.subr.bf16.mxu1 %v2188_v52  ;;  %v237_v4 = vpack.c.bf16 %v201_v3, %v198_v2 }
  0xa5   : > { %851 = vmatprep.subr.bf16.mxu0 %v2155_v8  ;;  %v210_v8 = vld [vmem:[%s2551_s3 + $0x100] sm:$0xff] }
  0xa7   : > { %783 = vmatmul.mubr.bf16.gmra.mrb[8].mxu0 %v2587_v9  ;;  %1897 = vmatpush3.bf16.msra.mxu1 %v2188_v52  ;;  %v213_v9 = vld [vmem:[%s2551_s3 + $0x118] sm:$0xff] }
  0xa8   : > { %792 = vmatprep.mubr.bf16.mxu0 %v2589_v11  ;;  %852 = vmatpush1.bf16.msra.mxu0 %v2153_v12  ;;  %v219_v11 = vld [vmem:[%s2551_s3 + $0x148] sm:$0xff]  ;;  %v243_v12 = vpack.c.bf16 %v213_v9, %v210_v8 }
  0xa9   : > { %853 = vmatprep.subr.bf16.mxu0 %v2158_v13  ;;  %v246_v13 = vpack.c.bf16 %v219_v11, %v216_v10 }
  0xaa   : > { %1029 = vmatmul.mubr.bf16.gmra.mrb[20].mxu1 %v241_v42 }
  0xab   : > { %1036 = vmatprep.mubr.bf16.mxu1 %v245_v43 }
  0xac   : > { %854 = vmatpush1.bf16.msra.mxu0 %v2156_v18 }
  0xad   : > { %855 = vmatprep.subr.bf16.mxu0 %v2161_v22 }
  0xaf   : > { %793 = vmatmul.mubr.bf16.gmra.mrb[12].mxu0 %v235_v23 }
  0xb0   : > { %802 = vmatprep.mubr.bf16.mxu0 %v239_v24  ;;  %856 = vmatpush1.bf16.msra.mxu0 %v2159_v25 }
  0xb1   : > { %857 = vmatprep.subr.bf16.mxu0 %v2164_v26 }
  0xb2   : > { %1037 = vmatmul.mubr.bf16.gmra.mrb[24].mxu1 %v244_v50 }
  0xb3   : > { %1044 = vmatprep.mubr.bf16.mxu1 %v248_v51 }
  0xb4   : > { %858 = vmatpush1.bf16.msra.mxu0 %v2162_v30 }
  0xb7   : > { %803 = vmatmul.mubr.bf16.gmra.mrb[16].mxu0 %v238_v34 }
  0xb8   : > { %812 = vmatprep.mubr.bf16.mxu0 %v242_v35 }
  0xba   : > { %1045 = vmatmul.mubr.bf16.gmra.mrb[28].mxu1 %v247_v55 }
  0xbb   : > { %1898 = vmatprep.mubr.bf16.mxu1 %v228_v59 }
  0xbf   : > { %813 = vmatmul.mubr.bf16.gmra.mrb[20].mxu0 %v241_v42 }
  0xc0   : > { %822 = vmatprep.mubr.bf16.mxu0 %v245_v43 }
  0xc2   : > { %1899 = vmatmul.mubr.bf16.vlgmr.msra.gmra.mrb[32].mxu1 %v231_v62 }
  0xc3   : > { %1902 = vmatprep.mubr.bf16.mxu1 %v234_v1 }
  0xc7   : > { %823 = vmatmul.mubr.bf16.gmra.mrb[24].mxu0 %v244_v50 }
  0xc8   : > { %832 = vmatprep.mubr.bf16.mxu0 %v248_v51 }
  0xca   : > { %1903 = vmatmul.mubr.bf16.gmra.mrb[36].mxu1 %v237_v4 }
  0xcb   : > { %1906 = vmatprep.mubr.bf16.mxu1 %v240_v7 }
  0xcf   : > { %833 = vmatmul.mubr.bf16.gmra.mrb[28].mxu0 %v247_v55 }
  0xd0   : > { %875 = vmatprep.mubr.bf16.mxu0 %v2389_v56 }
  0xd2   : > { %1907 = vmatmul.mubr.bf16.gmra.mrb[40].mxu1 %v243_v12 }
  0xd3   : > { %1910 = vmatprep.mubr.bf16.mxu1 %v246_v13 }
  0xd7   : > { %876 = vmatmul.mubr.bf16.vlgmr.msra.gmra.mrb[0].mxu0 %v228_v59 }
  0xd8   : > { %885 = vmatprep.mubr.bf16.mxu0 %v2389_v56 }
  0xda   : > { %1911 = vmatmul.mubr.bf16.gmra.mrb[44].mxu1 %v249_v16 }
  0xdf   : > { %886 = vmatmul.mubr.bf16.gmra.mrb[4].mxu0 %v231_v62 }
  0xe0   : > { %895 = vmatprep.mubr.bf16.mxu0 %v2389_v56 }
  0xe7   : > { %896 = vmatmul.mubr.bf16.gmra.mrb[8].mxu0 %v234_v1 }
  0xe8   : > { %905 = vmatprep.mubr.bf16.mxu0 %v2389_v56 }
  0xef   : > { %906 = vmatmul.mubr.bf16.gmra.mrb[12].mxu0 %v237_v4 }
  0xf0   : > { %915 = vmatprep.mubr.bf16.mxu0 %v2389_v56 }
  0xf7   : > { %916 = vmatmul.mubr.bf16.gmra.mrb[16].mxu0 %v240_v7 }
  0xf8   : > { %925 = vmatprep.mubr.bf16.mxu0 %v2389_v56 }
  0xff   : > { %926 = vmatmul.mubr.bf16.gmra.mrb[20].mxu0 %v243_v12 }
 0x100   : > { %935 = vmatprep.mubr.bf16.mxu0 %v2389_v56 }
 0x107   : > { %936 = vmatmul.mubr.bf16.gmra.mrb[24].mxu0 %v246_v13 }
 0x108   : > { %945 = vmatprep.mubr.bf16.mxu0 %v2389_v56 }
 0x10f   : > { %946 = vmatmul.mubr.bf16.gmra.mrb[28].mxu0 %v249_v16 }
 0x155   : > { %v1786_v17 = vpop.f32.mrb[0].mxu1 }
 0x156   : > { %v1787_v18 = vpop.f32.mrb[1].mxu1 }
 0x157   : > { %v2633_v19 = vadd.f32 %v1787_v18, %v1786_v17  ;;  %v1789_v20 = vpop.f32.mrb[2].mxu1 }
 0x158   : > { %v1790_v21 = vpop.f32.mrb[3].mxu1 }
 0x159   : > { %v2635_v22 = vadd.f32 %v1790_v21, %v1789_v20 }
 0x15d   : > { %v1792_v23 = vpop.f32.mrb[4].mxu1 }
 0x15e   : > { %v1793_v24 = vpop.f32.mrb[5].mxu1 }
 0x15f   : > { %v2637_v25 = vadd.f32 %v1793_v24, %v1792_v23  ;;  %v1795_v26 = vpop.f32.mrb[6].mxu1 }
 0x160   : > { %v1796_v27 = vpop.f32.mrb[7].mxu1 }
 0x161   : > { %v2639_v28 = vadd.f32 %v1796_v27, %v1795_v26 }
 0x165   : > { %v1798_v29 = vpop.f32.mrb[8].mxu1 }
 0x166   : > { %v1799_v30 = vpop.f32.mrb[9].mxu1 }
 0x167   : > { %v2641_v31 = vadd.f32 %v1799_v30, %v1798_v29  ;;  %v1801_v32 = vpop.f32.mrb[10].mxu1 }
 0x168   : > { %v1802_v33 = vpop.f32.mrb[11].mxu1 }
 0x169   : > { %v2643_v34 = vadd.f32 %v1802_v33, %v1801_v32 }
 0x16d   : > { %v1804_v35 = vpop.f32.mrb[12].mxu1 }
 0x16e   : > { %v1805_v36 = vpop.f32.mrb[13].mxu1 }
 0x16f   : > { %v2645_v37 = vadd.f32 %v1805_v36, %v1804_v35  ;;  %v1807_v38 = vpop.f32.mrb[14].mxu1 }
 0x170   : > { %v1808_v39 = vpop.f32.mrb[15].mxu1 }
 0x171   : > { %v2647_v40 = vadd.f32 %v1808_v39, %v1807_v38 }
 0x175   : > { %v1810_v41 = vpop.f32.mrb[16].mxu1 }
 0x176   : > { %v1811_v42 = vpop.f32.mrb[17].mxu1 }
 0x177   : > { %v2649_v43 = vadd.f32 %v1811_v42, %v1810_v41  ;;  %v1813_v44 = vpop.f32.mrb[18].mxu1 }
 0x178   : > { %v1814_v45 = vpop.f32.mrb[19].mxu1 }
 0x179   : > { %v2651_v46 = vadd.f32 %v1814_v45, %v1813_v44 }
 0x17d   : > { %v1816_v47 = vpop.f32.mrb[20].mxu1 }
 0x17e   : > { %v1817_v49 = vpop.f32.mrb[21].mxu1 }
 0x17f   : > { %v2653_v51 = vadd.f32 %v1817_v49, %v1816_v47  ;;  %v1819_v52 = vpop.f32.mrb[22].mxu1 }
 0x180   : > { %v1820_v54 = vpop.f32.mrb[23].mxu1 }
 0x181   : > { %v2655_v57 = vadd.f32 %v1820_v54, %v1819_v52 }
 0x185   : > { %v1822_v59 = vpop.f32.mrb[24].mxu1 }
 0x186   : > { %v1823_v61 = vpop.f32.mrb[25].mxu1 }
 0x187   : > { %v2659_v63 = vadd.f32 %v1823_v61, %v1822_v59  ;;  %v1825_v0 = vpop.f32.mrb[26].mxu1 }
 0x188   : > { %v1826_v2 = vpop.f32.mrb[27].mxu1 }
 0x189   : > { %v2663_v5 = vadd.f32 %v1826_v2, %v1825_v0 }
 0x18d   : > { %v1828_v7 = vpop.f32.mrb[28].mxu1 }
 0x18e   : > { %v1829_v9 = vpop.f32.mrb[29].mxu1 }
 0x18f   : > { %v2669_v11 = vadd.f32 %v1829_v9, %v1828_v7  ;;  %v1831_v12 = vpop.f32.mrb[30].mxu1 }
 0x190   : > { %v1832_v14 = vpop.f32.mrb[31].mxu1 }
 0x191   : > { %v2673_v17 = vadd.f32 %v1832_v14, %v1831_v12 }
 0x195   : > { %v1900_v20 = vpop.f32.mrb[32].mxu1 }
 0x196   : > { %v1096_v23 = vadd.f32 %v1900_v20, %v2637_v25  ;;  %v1087_v24 = vpop.f32.mrb[33].mxu1 }
 0x197   : > { %v1088_v27 = vadd.f32 %v2633_v19, %v1087_v24  ;;  %v1901_v29 = vpop.f32.mrb[34].mxu1 }
 0x198   : > { %v1099_v32 = vadd.f32 %v1901_v29, %v2639_v28  ;;  %v1090_v33 = vpop.f32.mrb[35].mxu1 }
 0x199   : > { %v1091_v38 = vadd.f32 %v2635_v22, %v1090_v33 }
 0x19a   : > { %v2687_v41 = vpack.c.bf16 %v1099_v32, %v1096_v23 }
 0x19b   : > { %v2689_v25 = vpack.c.bf16 %v1091_v38, %v1088_v27 }
 0x19d   : > { %1946 = vmatprep.subr.bf16.mxu0 %v2689_v25  ;;  %v1904_v19 = vpop.f32.mrb[36].mxu1 }
 0x19e   : > { %1947 = vmatpush3.bf16.msra.mxu0 %v2689_v25  ;;  %v1112_v28 = vadd.f32 %v1904_v19, %v2645_v37  ;;  %v1103_v44 = vpop.f32.mrb[37].mxu1 }
 0x19f   : > { %1948 = vmatprep.subr.bf16.mxu0 %v2687_v41  ;;  %v1104_v22 = vadd.f32 %v2641_v31, %v1103_v44  ;;  %v1905_v47 = vpop.f32.mrb[38].mxu1 }
 0x1a0   : > { %v1115_v49 = vadd.f32 %v1905_v47, %v2647_v40 }
 0x1a2   : > { %1949 = vmatpush3.bf16.msra.mxu0 %v2687_v41 }
 0x1aa   : > { %v877_v48 = vpop.f32.mrb[0].mxu0 }
 0x1ab   : > { %v879_v50 = vpop.f32.mrb[1].mxu0 }
 0x1ac   : > { %v881_v53 = vpop.f32.mrb[2].mxu0 }
 0x1ad   : > { %v1150_v55 = vpack.c.bf16 %v881_v53, %v877_v48  ;;  %v883_v56 = vpop.f32.mrb[3].mxu0 }
 0x1ae   : > { %v1151_v58 = vpack.c.bf16 %v883_v56, %v879_v50  ;;  %v1106_v50 = vpop.f32.mrb[39].mxu1 }
 0x1af   : > { %1914 = vmatprep.subr.bf16.mxu1 %v1150_v55  ;;  %v1107_v54 = vadd.f32 %v2643_v34, %v1106_v50  ;;  %v1908_v31 = vpop.f32.mrb[40].mxu1 }
 0x1b0   : > { %1915 = vmatpush3.bf16.xpose.msra.mxu1 %v1150_v55  ;;  %1930 = vmatprep.mubr.bf16.mxu1 %v1151_v58  ;;  %v2705_v55 = vpack.c.bf16 %v1115_v49, %v1112_v28  ;;  %v1128_v58 = vadd.f32 %v1908_v31, %v2653_v51  ;;  %v1119_v34 = vpop.f32.mrb[41].mxu1 }
 0x1b1   : > { %v2707_v56 = vpack.c.bf16 %v1107_v54, %v1104_v22  ;;  %v1909_v61 = vpop.f32.mrb[42].mxu1 }
 0x1b2   : > { %v887_v60 = vpop.f32.mrb[4].mxu0  ;;  %v1122_v2 = vpop.f32.mrb[43].mxu1 }
 0x1b3   : > { %v2657_v62 = vpop.f32.mrb[5].mxu0  ;;  %1950 = vmatprep.subr.bf16.mxu0 %v2707_v56 }
 0x1b4   : > { %v891_v1 = vpop.f32.mrb[6].mxu0  ;;  %1951 = vmatpush3.bf16.msra.mxu0 %v2707_v56 }
 0x1b5   : > { %v1153_v3 = vpack.c.bf16 %v891_v1, %v887_v60  ;;  %v2661_v4 = vpop.f32.mrb[7].mxu0  ;;  %1952 = vmatprep.subr.bf16.mxu0 %v2705_v55  ;;  %v1120_v60 = vadd.f32 %v2649_v43, %v1119_v34  ;;  %v1131_v1 = vadd.f32 %v1909_v61, %v2655_v57 }
 0x1b6   : > { %v1154_v6 = vpack.c.bf16 %v2661_v4, %v2657_v62  ;;  %v1271_v62 = vlaneseq }
 0x1b7   : > { %1916 = vmatprep.subr.bf16.mxu1 %v1153_v3  ;;  %v1167_v51 = vpack.c.bf16 %v1131_v1, %v1128_v58 }
 0x1b8   : > { %1917 = vmatpush3.bf16.xpose.msra.mxu1 %v1153_v3  ;;  %1953 = vmatpush3.bf16.msra.mxu0 %v2705_v55  ;;  %v2744_v4 = vshrl.u32 %v1271_v62, 7 }
 0x1ba   : > { %v897_v8 = vpop.f32.mrb[8].mxu0  ;;  %v1277_v44 = vadd.s32 40, %v2744_v4  ;;  %v1276_v50 = vadd.s32 32, %v2744_v4  ;;  %v1281_v61 = vadd.s32 72, %v2744_v4 }
 0x1bb   : > { %v2667_v10 = vpop.f32.mrb[9].mxu0 }
 0x1bc   : > { %v901_v13 = vpop.f32.mrb[10].mxu0 }
 0x1bd   : > { %v1156_v15 = vpack.c.bf16 %v901_v13, %v897_v8  ;;  %v2671_v16 = vpop.f32.mrb[11].mxu0  ;;  %v1123_v8 = vadd.f32 %v2651_v46, %v1122_v2  ;;  %v1912_v13 = vpop.f32.mrb[44].mxu1 }
 0x1be   : > { %v1157_v18 = vpack.c.bf16 %v2671_v16, %v2667_v10  ;;  %v1144_v14 = vadd.f32 %v1912_v13, %v2669_v11  ;;  %v1135_v57 = vpop.f32.mrb[45].mxu1  ;;  %v1275_v10 = vadd.s32 24, %v2744_v4 }
 0x1bf   : > { %1918 = vmatprep.subr.bf16.mxu1 %v1156_v15  ;;  %v1164_v12 = vpack.c.bf16 %v1123_v8, %v1120_v60  ;;  %v1136_v20 = vadd.f32 %v2659_v63, %v1135_v57  ;;  %v1913_v46 = vpop.f32.mrb[46].mxu1 }
 0x1c0   : > { %1919 = vmatpush3.bf16.xpose.msra.mxu1 %v1156_v15  ;;  %v1147_v23 = vadd.f32 %v1913_v46, %v2673_v17  ;;  %v1138_v24 = vpop.f32.mrb[47].mxu1 }
 0x1c1   : > { %1954 = vmatprep.subr.bf16.mxu0 %v1164_v12 }
 0x1c2   : > { %v907_v21 = vpop.f32.mrb[12].mxu0  ;;  %1955 = vmatpush3.bf16.msra.mxu0 %v1164_v12  ;;  %v1173_v33 = vpack.c.bf16 %v1147_v23, %v1144_v14  ;;  %v1285_v14 = vadd.s32 104, %v2744_v4 }
 0x1c3   : > { %v2678_v26 = vpop.f32.mrb[13].mxu0  ;;  %1956 = vmatprep.subr.bf16.mxu0 %v1167_v51 }
 0x1c4   : > { %v911_v30 = vpop.f32.mrb[14].mxu0 }
 0x1c5   : > { %v1159_v35 = vpack.c.bf16 %v911_v30, %v907_v21  ;;  %v2682_v36 = vpop.f32.mrb[15].mxu0  ;;  %v1139_v30 = vadd.f32 %v2663_v5, %v1138_v24  ;;  %v1274_v5 = vadd.s32 16, %v2744_v4 }
 0x1c6   : > { %v1160_v39 = vpack.c.bf16 %v2682_v36, %v2678_v26  ;;  %1957 = vmatpush3.bf16.msra.mxu0 %v1167_v51 }
 0x1c7   : > { %1920 = vmatprep.subr.bf16.mxu1 %v1159_v35 }
 0x1c8   : > { %1921 = vmatpush3.bf16.xpose.msra.mxu1 %v1159_v35  ;;  %v1170_v35 = vpack.c.bf16 %v1139_v30, %v1136_v20  ;;  %v1287_v20 = vadd.s32 120, %v2744_v4 }
 0x1ca   : > { %v917_v42 = vpop.f32.mrb[16].mxu0  ;;  %1958 = vmatprep.subr.bf16.mxu0 %v1170_v35 }
 0x1cb   : > { %v2694_v45 = vpop.f32.mrb[17].mxu0  ;;  %1959 = vmatpush3.bf16.msra.mxu0 %v1170_v35 }
 0x1cc   : > { %v921_v48 = vpop.f32.mrb[18].mxu0  ;;  %1960 = vmatprep.subr.bf16.mxu0 %v1173_v33 }
 0x1cd   : > { %v1162_v52 = vpack.c.bf16 %v921_v48, %v917_v42  ;;  %v2699_v53 = vpop.f32.mrb[19].mxu0 }
 0x1ce   : > { %v1163_v37 = vpack.c.bf16 %v2699_v53, %v2694_v45  ;;  %v1278_v45 = vadd.s32 48, %v2744_v4  ;;  %v1280_v53 = vadd.s32 64, %v2744_v4 }
 0x1cf   : > { %1922 = vmatprep.subr.bf16.mxu1 %v1162_v52  ;;  %1961 = vmatpush3.bf16.msra.mxu0 %v1173_v33 }
 0x1d0   : > { %1923 = vmatpush3.bf16.xpose.msra.mxu1 %v1162_v52 }
 0x1d2   : > { %v927_v40 = vpop.f32.mrb[20].mxu0 }
 0x1d3   : > { %v2712_v59 = vpop.f32.mrb[21].mxu0 }
 0x1d4   : > { %v931_v0 = vpop.f32.mrb[22].mxu0 }
 0x1d5   : > { %v1165_v3 = vpack.c.bf16 %v931_v0, %v927_v40  ;;  %v933_v7 = vpop.f32.mrb[23].mxu0  ;;  %v1284_v0 = vadd.s32 96, %v2744_v4 }
 0x1d6   : > { %v1166_v9 = vpack.c.bf16 %v933_v7, %v2712_v59  ;;  %v1286_v7 = vadd.s32 112, %v2744_v4 }
 0x1d7   : > { %1924 = vmatprep.subr.bf16.mxu1 %v1165_v3 }
 0x1d8   : > { %1925 = vmatpush3.bf16.xpose.msra.mxu1 %v1165_v3  ;;  %v1279_v3 = vadd.s32 56, %v2744_v4 }
 0x1da   : > { %v937_v43 = vpop.f32.mrb[24].mxu0 }
 0x1db   : > { %v939_v15 = vpop.f32.mrb[25].mxu0 }
 0x1dc   : > { %v941_v21 = vpop.f32.mrb[26].mxu0 }
 0x1dd   : > { %v1168_v27 = vpack.c.bf16 %v941_v21, %v937_v43  ;;  %v943_v29 = vpop.f32.mrb[27].mxu0 }
 0x1de   : > { %v1169_v32 = vpack.c.bf16 %v943_v29, %v939_v15 }
 0x1df   : > { %1926 = vmatprep.subr.bf16.mxu1 %v1168_v27 }
 0x1e0   : > { %1927 = vmatpush3.bf16.xpose.msra.mxu1 %v1168_v27 }
 0x1e2   : > { %v947_v11 = vpop.f32.mrb[28].mxu0 }
 0x1e3   : > { %v949_v38 = vpop.f32.mrb[29].mxu0 }
 0x1e4   : > { %v951_v63 = vpop.f32.mrb[30].mxu0 }
 0x1e5   : > { %v1171_v19 = vpack.c.bf16 %v951_v63, %v947_v11  ;;  %v953_v42 = vpop.f32.mrb[31].mxu0 }
 0x1e6   : > { %v1172_v17 = vpack.c.bf16 %v953_v42, %v949_v38 }
 0x1e7   : > { %1928 = vmatprep.subr.bf16.mxu1 %v1171_v19 }
 0x1e8   : > { %1929 = vmatpush3.bf16.xpose.msra.mxu1 %v1171_v19 }
 0x1e9   : > { %1978 = vmatprep.subr.bf16.mxu1 %v2689_v25 }
 0x1ef   : > { %1931 = vmatmul.mubr.bf16.vlgmr.msra.gmra.mrb[48].mxu1 %v1154_v6  ;;  %v2747_v6 = vand.u32 127, %v1271_v62 }
 0x1f0   : > { %1934 = vmatprep.mubr.bf16.mxu1 %v1157_v18  ;;  %1986 = vmatpush3.bf16.msra.mxu1 %v2689_v25 }
 0x1f1   : > { %1979 = vmatprep.subr.bf16.mxu1 %v2687_v41  ;;  %vm1292_vm0 = vcmp.gt.s32.totalorder %v2747_v6, %v1274_v5  ;;  %vm1293_vm1 = vcmp.gt.s32.totalorder %v2747_v6, %v1275_v10  ;;  %vm1290_vm2 = vcmp.gt.s32.totalorder %v2747_v6, %v2744_v4  ;;  %vm1295_vm4 = vcmp.gt.s32.totalorder %v2747_v6, %v1277_v44 }
 0x1f2   : > { %vm1296_vm5 = vcmp.gt.s32.totalorder %v2747_v6, %v1278_v45  ;;  %vm1294_vm6 = vcmp.gt.s32.totalorder %v2747_v6, %v1276_v50  ;;  %vm1298_vm7 = vcmp.gt.s32.totalorder %v2747_v6, %v1280_v53  ;;  %vm1299_vm10 = vcmp.gt.s32.totalorder %v2747_v6, %v1281_v61 }
 0x1f3   : > { %vm1302_vm11 = vcmp.gt.s32.totalorder %v2747_v6, %v1284_v0  ;;  %vm1297_vm12 = vcmp.gt.s32.totalorder %v2747_v6, %v1279_v3  ;;  %vm1304_vm13 = vcmp.gt.s32.totalorder %v2747_v6, %v1286_v7  ;;  %vm1303_vm14 = vcmp.gt.s32.totalorder %v2747_v6, %v1285_v14 }
 0x1f4   : > { %1987 = vmatpush3.bf16.msra.mxu1 %v2687_v41  ;;  %vm1305_vm15 = vcmp.gt.s32.totalorder %v2747_v6, %v1287_v20 }
 0x1f5   : > { %1980 = vmatprep.subr.bf16.mxu1 %v2707_v56 }
 0x1f7   : > { %1935 = vmatmul.mubr.bf16.gmra.mrb[52].mxu1 %v1160_v39  ;;  %v1273_v39 = vadd.s32 8, %v2744_v4 }
 0x1f8   : > { %1938 = vmatprep.mubr.bf16.mxu1 %v1163_v37  ;;  %1988 = vmatpush3.bf16.msra.mxu1 %v2707_v56  ;;  %v1283_v56 = vadd.s32 88, %v2744_v4 }
 0x1f9   : > { %1981 = vmatprep.subr.bf16.mxu1 %v2705_v55  ;;  %vm1291_vm3 = vcmp.gt.s32.totalorder %v2747_v6, %v1273_v39 }
 0x1fa   : > { %vm1301_vm9 = vcmp.gt.s32.totalorder %v2747_v6, %v1283_v56 }
 0x1fc   : > { %1989 = vmatpush3.bf16.msra.mxu1 %v2705_v55  ;;  %v1282_v55 = vadd.s32 80, %v2744_v4 }
 0x1fd   : > { %1982 = vmatprep.subr.bf16.mxu1 %v1164_v12 }
 0x1fe   : > { %vm1300_vm8 = vcmp.gt.s32.totalorder %v2747_v6, %v1282_v55 }
 0x1ff   : > { %1939 = vmatmul.mubr.bf16.gmra.mrb[56].mxu1 %v1166_v9 }
 0x200   : > { %1942 = vmatprep.mubr.bf16.mxu1 %v1169_v32  ;;  %1990 = vmatpush3.bf16.msra.mxu1 %v1164_v12 }
 0x201   : > { %1983 = vmatprep.subr.bf16.mxu1 %v1167_v51 }
 0x204   : > { %1991 = vmatpush3.bf16.msra.mxu1 %v1167_v51 }
 0x205   : > { %1984 = vmatprep.subr.bf16.mxu1 %v1170_v35 }
 0x207   : > { %1943 = vmatmul.mubr.bf16.gmra.mrb[60].mxu1 %v1172_v17 }
 0x208   : > { %1992 = vmatpush3.bf16.msra.mxu1 %v1170_v35 }
 0x209   : > { %1985 = vmatprep.subr.bf16.mxu1 %v1173_v33 }
 0x20c   : > { %1993 = vmatpush3.bf16.msra.mxu1 %v1173_v33 }
 0x2c2   : > { %v1932_v16 = vpop.f32.mrb[48].mxu1 }
 0x2c3   : > { %v1208_v18 = vpop.f32.mrb[49].mxu1  ;;  %v2752_v26 = vsel %vm1292_vm0, -1e+30, %v1932_v16 }
 0x2c4   : > { %1326 = vmax.xlane.f32.xlu0 %v2752_v26  ;;  %v1933_v36 = vpop.f32.mrb[50].mxu1  ;;  %v2761_v28 = vsel %vm1290_vm2, -1e+30, %v1208_v18 }
 0x2c5   : > { %v1211_v41 = vpop.f32.mrb[51].mxu1  ;;  %v2758_v25 = vsel %vm1293_vm1, -1e+30, %v1933_v36 }
 0x2c6   : > { %1328 = vmax.xlane.f32.xlu1 %v2758_v25  ;;  %v2767_v48 = vsel %vm1291_vm3, -1e+30, %v1211_v41 }
 0x2c8   : > { %1322 = vmax.xlane.f32.xlu0 %v2761_v28 }
 0x2ca   : > { %v1936_v22 = vpop.f32.mrb[52].mxu1 }
 0x2cb   : > { %v1224_v47 = vpop.f32.mrb[53].mxu1  ;;  %v2777_v37 = vsel %vm1296_vm5, -1e+30, %v1936_v22 }
 0x2cc   : > { %1324 = vmax.xlane.f32.xlu0 %v2767_v48  ;;  %v1937_v49 = vpop.f32.mrb[54].mxu1  ;;  %v2784_v58 = vsel %vm1294_vm6, -1e+30, %v1224_v47 }
 0x2cd   : > { %v1227_v52 = vpop.f32.mrb[55].mxu1  ;;  %v2813_v57 = vsel %vm1297_vm12, -1e+30, %v1937_v49 }
 0x2ce   : > { %v2774_v54 = vsel %vm1295_vm4, -1e+30, %v1227_v52 }
 0x2cf   : > { %1332 = vmax.xlane.f32.xlu1 %v2774_v54 }
 0x2d0   : > { %1334 = vmax.xlane.f32.xlu0 %v2777_v37 }
 0x2d2   : > { %v1940_v31 = vpop.f32.mrb[56].mxu1 }
 0x2d3   : > { %v1240_v40 = vpop.f32.mrb[57].mxu1  ;;  %v2794_v1 = vsel %vm1300_vm8, -1e+30, %v1940_v31 }
 0x2d4   : > { %1330 = vmax.xlane.f32.xlu0 %v2784_v58  ;;  %v1941_v34 = vpop.f32.mrb[58].mxu1  ;;  %v2787_v59 = vsel %vm1298_vm7, -1e+30, %v1240_v40 }
 0x2d5   : > { %1338 = vmax.xlane.f32.xlu1 %v2787_v59  ;;  %v1243_v60 = vpop.f32.mrb[59].mxu1  ;;  %v2797_v2 = vsel %vm1301_vm9, -1e+30, %v1941_v34 }
 0x2d6   : > { %v2804_v12 = vsel %vm1299_vm10, -1e+30, %v1243_v60 }
 0x2d8   : > { %1342 = vmax.xlane.f32.xlu0 %v2794_v1 }
 0x2d9   : > { %1344 = vmax.xlane.f32.xlu1 %v2797_v2 }
 0x2da   : > { %v1944_v8 = vpop.f32.mrb[60].mxu1 }
 0x2db   : > { %v1256_v9 = vpop.f32.mrb[61].mxu1  ;;  %v2815_v15 = vsel %vm1304_vm13, -1e+30, %v1944_v8 }
 0x2dc   : > { %v1945_v51 = vpop.f32.mrb[62].mxu1  ;;  %v2806_v13 = vsel %vm1302_vm11, -1e+30, %v1256_v9 }
 0x2dd   : > { %1340 = vmax.xlane.f32.xlu1 %v2804_v12  ;;  %1346 = vmax.xlane.f32.xlu0 %v2806_v13  ;;  %v1259_v43 = vpop.f32.mrb[63].mxu1  ;;  %v2825_v21 = vsel %vm1305_vm15, -1e+30, %v1945_v51 }
 0x2de   : > { %v2821_v46 = vsel %vm1303_vm14, -1e+30, %v1259_v43 }
 0x2e1   : > { %1336 = vmax.xlane.f32.xlu1 %v2813_v57  ;;  %1350 = vmax.xlane.f32.xlu0 %v2815_v15 }
 0x2e5   : > { %1348 = vmax.xlane.f32.xlu1 %v2821_v46 }
 0x2e9   : > { %1352 = vmax.xlane.f32.xlu1 %v2825_v21 }
 0x351   : > { %v1327_v23 = vpop.xlane.xlu0 %1326 }
 0x352   : > { %v1356_v24 = vsub.f32 %v2752_v26, %v1327_v23 }
 0x353   : > { %v1329_v27 = vpop.xlane.xlu1 %1328 }
 0x354   : > { %v1374_v29 = vmul.f32 1.442695, %v1356_v24  ;;  %v1357_v30 = vsub.f32 %v2758_v25, %v1329_v27 }
 0x355   : > { %v1323_v32 = vpop.xlane.xlu0 %1322 }
 0x356   : > { %2189 = vpow2.f32 %v1374_v29  ;;  %v1376_v33 = vmul.f32 1.442695, %v1357_v30  ;;  %v1354_v35 = vsub.f32 %v2761_v28, %v1323_v32 }
 0x358   : > { %2191 = vpow2.f32 %v1376_v33  ;;  %v1370_v11 = vmul.f32 1.442695, %v1354_v35 }
 0x359   : > { %v1325_v38 = vpop.xlane.xlu0 %1324 }
 0x35a   : > { %2193 = vpow2.f32 %v1370_v11  ;;  %v1355_v63 = vsub.f32 %v2767_v48, %v1325_v38 }
 0x35c   : > { %v1372_v19 = vmul.f32 1.442695, %v1355_v63  ;;  %v1333_v42 = vpop.xlane.xlu1 %1332 }
 0x35d   : > { %v1359_v17 = vsub.f32 %v2774_v54, %v1333_v42  ;;  %v1335_v62 = vpop.xlane.xlu0 %1334 }
 0x35e   : > { %2195 = vpow2.f32 %v1372_v19  ;;  %v1360_v4 = vsub.f32 %v2777_v37, %v1335_v62 }
 0x35f   : > { %v1380_v10 = vmul.f32 1.442695, %v1359_v17 }
 0x360   : > { %v2190_v5 = vpop.eup %2189  ;;  %v1382_v6 = vmul.f32 1.442695, %v1360_v4 }
 0x361   : > { %v1331_v16 = vpop.xlane.xlu0 %1330  ;;  %1406 = vadd.xlane.f32.xlu0 %v2190_v5 }
 0x362   : > { %v2192_v18 = vpop.eup %2191  ;;  %2197 = vpow2.f32 %v1382_v6  ;;  %v1358_v26 = vsub.f32 %v2784_v58, %v1331_v16  ;;  %v1339_v36 = vpop.xlane.xlu1 %1338 }
 0x363   : > { %1408 = vadd.xlane.f32.xlu1 %v2192_v18  ;;  %2199 = vpow2.f32 %v1380_v10  ;;  %v1362_v25 = vsub.f32 %v2787_v59, %v1339_v36  ;;  %v1435_v37 = vpack.c.bf16 %v2192_v18, %v2190_v5 }
 0x364   : > { %v2194_v39 = vpop.eup %2193  ;;  %v1378_v41 = vmul.f32 1.442695, %v1358_v26 }
 0x365   : > { %v1343_v28 = vpop.xlane.xlu0 %1342  ;;  %1402 = vadd.xlane.f32.xlu0 %v2194_v39  ;;  %v1386_v49 = vmul.f32 1.442695, %v1362_v25 }
 0x366   : > { %2201 = vpow2.f32 %v1378_v41  ;;  %v1364_v44 = vsub.f32 %v2794_v1, %v1343_v28  ;;  %v1345_v45 = vpop.xlane.xlu1 %1344 }
 0x367   : > { %v1365_v22 = vsub.f32 %v2797_v2, %v1345_v45 }
 0x368   : > { %v2196_v47 = vpop.eup %2195  ;;  %v1390_v48 = vmul.f32 1.442695, %v1364_v44 }
 0x369   : > { %1404 = vadd.xlane.f32.xlu1 %v2196_v47  ;;  %v1434_v50 = vpack.c.bf16 %v2196_v47, %v2194_v39  ;;  %v1392_v52 = vmul.f32 1.442695, %v1365_v22 }
 0x36a   : > { %2203 = vpow2.f32 %v1390_v48  ;;  %v1341_v53 = vpop.xlane.xlu1 %1340  ;;  %v1347_v54 = vpop.xlane.xlu0 %1346 }
 0x36b   : > { %v1363_v55 = vsub.f32 %v2804_v12, %v1341_v53  ;;  %v1366_v56 = vsub.f32 %v2806_v13, %v1347_v54  ;;  %1962 = vmatprep.mubr.bf16.mxu0 %v1434_v50  ;;  %2205 = vpow2.f32 %v1386_v49 }
 0x36c   : > { %v2198_v31 = vpop.eup %2197  ;;  %1963 = vmatmul.mubr.bf16.vlgmr.msra.gmra.mrb[32].mxu0 %v1435_v37  ;;  %2207 = vpow2.f32 %v1392_v52 }
 0x36d   : > { %v1388_v40 = vmul.f32 1.442695, %v1363_v55  ;;  %1414 = vadd.xlane.f32.xlu0 %v2198_v31  ;;  %v1394_v58 = vmul.f32 1.442695, %v1366_v56  ;;  %v2200_v60 = vpop.eup %2199 }
 0x36e   : > { %v1337_v34 = vpop.xlane.xlu1 %1336  ;;  %v1351_v59 = vpop.xlane.xlu0 %1350 }
 0x36f   : > { %2209 = vpow2.f32 %v1388_v40  ;;  %v1361_v61 = vsub.f32 %v2813_v57, %v1337_v34  ;;  %v1368_v0 = vsub.f32 %v2815_v15, %v1351_v59 }
 0x370   : > { %v2202_v1 = vpop.eup %2201  ;;  %2211 = vpow2.f32 %v1394_v58 }
 0x371   : > { %v1384_v2 = vmul.f32 1.442695, %v1361_v61  ;;  %1410 = vadd.xlane.f32.xlu0 %v2202_v1  ;;  %v1436_v3 = vpack.c.bf16 %v2200_v60, %v2202_v1  ;;  %v1398_v7 = vmul.f32 1.442695, %v1368_v0 }
 0x372   : > { %v1349_v8 = vpop.xlane.xlu1 %1348 }
 0x373   : > { %2213 = vpow2.f32 %v1384_v2  ;;  %v1367_v9 = vsub.f32 %v2821_v46, %v1349_v8  ;;  %1966 = vmatprep.mubr.bf16.mxu0 %v1436_v3 }
 0x374   : > { %v2204_v51 = vpop.eup %2203  ;;  %2215 = vpow2.f32 %v1398_v7 }
 0x375   : > { %v1396_v12 = vmul.f32 1.442695, %v1367_v9  ;;  %1422 = vadd.xlane.f32.xlu0 %v2204_v51  ;;  %v2206_v43 = vpop.eup %2205 }
 0x376   : > { %v1353_v13 = vpop.xlane.xlu1 %1352  ;;  %v2208_v57 = vpop.eup %2207 }
 0x377   : > { %2217 = vpow2.f32 %v1396_v12  ;;  %v1369_v14 = vsub.f32 %v2825_v21, %v1353_v13  ;;  %v1439_v24 = vpack.c.bf16 %v2208_v57, %v2204_v51 }
 0x379   : > { %v2210_v15 = vpop.eup %2209  ;;  %v1400_v20 = vmul.f32 1.442695, %v1369_v14  ;;  %1418 = vadd.xlane.f32.xlu0 %v2206_v43 }
 0x37a   : > { %v1438_v23 = vpack.c.bf16 %v2210_v15, %v2206_v43  ;;  %v2212_v27 = vpop.eup %2211 }
 0x37b   : > { %2219 = vpow2.f32 %v1400_v20 }
 0x37c   : > { %1970 = vmatprep.mubr.bf16.mxu1 %v1438_v23 }
 0x37d   : > { %v2214_v46 = vpop.eup %2213  ;;  %1971 = vmatmul.mubr.bf16.vlgmr.msra.gmra.mrb[64].mxu1 %v1439_v24  ;;  %1426 = vadd.xlane.f32.xlu0 %v2212_v27 }
 0x37e   : > { %1416 = vadd.xlane.f32.xlu1 %v2214_v46  ;;  %v1437_v29 = vpack.c.bf16 %v2214_v46, %v2198_v31  ;;  %v2216_v30 = vpop.eup %2215 }
 0x380   : > { %1967 = vmatmul.mubr.bf16.gmra.mrb[36].mxu0 %v1437_v29 }
 0x381   : > { %v2218_v32 = vpop.eup %2217  ;;  %1430 = vadd.xlane.f32.xlu0 %v2216_v30 }
 0x382   : > { %1412 = vadd.xlane.f32.xlu1 %v2200_v60  ;;  %v1440_v21 = vpack.c.bf16 %v2218_v32, %v2212_v27 }
 0x384   : > { %1974 = vmatprep.mubr.bf16.mxu1 %v1440_v21 }
 0x385   : > { %v2220_v33 = vpop.eup %2219 }
 0x386   : > { %1424 = vadd.xlane.f32.xlu1 %v2208_v57  ;;  %v1441_v35 = vpack.c.bf16 %v2220_v33, %v2216_v30 }
 0x388   : > { %1975 = vmatmul.mubr.bf16.gmra.mrb[68].mxu1 %v1441_v35 }
 0x38a   : > { %1420 = vadd.xlane.f32.xlu1 %v2210_v15 }
 0x38e   : > { %1428 = vadd.xlane.f32.xlu1 %v2218_v32 }
 0x392   : > { %1432 = vadd.xlane.f32.xlu1 %v2220_v33 }
 0x3ee   : > { %v1407_v11 = vpop.xlane.xlu0 %1406 }
 0x3ef   : > { %2221 = vrcp.f32 %v1407_v11 }
 0x3f0   : > { %v1409_v38 = vpop.xlane.xlu1 %1408 }
 0x3f2   : > { %v1403_v63 = vpop.xlane.xlu0 %1402 }
 0x3f3   : > { %2223 = vrcp.f32 %v1403_v63 }
 0x3f4   : > { %2225 = vrcp.f32 %v1409_v38 }
 0x3f6   : > { %v1405_v19 = vpop.xlane.xlu1 %1404 }
 0x3f7   : > { %2227 = vrcp.f32 %v1405_v19 }
 0x3f9   : > { %v2222_v10 = vpop.eup %2221 }
 0x3fa   : > { %v1415_v42 = vpop.xlane.xlu0 %1414 }
 0x3fb   : > { %2229 = vrcp.f32 %v1415_v42 }
 0x3fd   : > { %v2224_v18 = vpop.eup %2223 }
 0x3fe   : > { %v1411_v62 = vpop.xlane.xlu0 %1410  ;;  %v2226_v39 = vpop.eup %2225 }
 0x401   : > { %v2228_v28 = vpop.eup %2227 }
 0x402   : > { %v1423_v5 = vpop.xlane.xlu0 %1422 }
 0x403   : > { %2231 = vrcp.f32 %v1423_v5 }
 0x405   : > { %v2230_v53 = vpop.eup %2229 }
 0x406   : > { %v1419_v44 = vpop.xlane.xlu0 %1418 }
 0x407   : > { %2233 = vrcp.f32 %v1419_v44 }
 0x40a   : > { %v1427_v49 = vpop.xlane.xlu0 %1426 }
 0x40b   : > { %v1417_v17 = vpop.xlane.xlu1 %1416 }
 0x40d   : > { %v2232_v54 = vpop.eup %2231 }
 0x40e   : > { %v1431_v52 = vpop.xlane.xlu0 %1430 }
 0x40f   : > { %v1413_v4 = vpop.xlane.xlu1 %1412 }
 0x411   : > { %v2234_v56 = vpop.eup %2233 }
 0x413   : > { %v1425_v6 = vpop.xlane.xlu1 %1424 }
 0x414   : > { %2235 = vrcp.f32 %v1425_v6 }
 0x417   : > { %v1421_v48 = vpop.xlane.xlu1 %1420 }
 0x418   : > { %2237 = vrcp.f32 %v1421_v48 }
 0x419   : > { %2239 = vrcp.f32 %v1411_v62 }
 0x41a   : > { %2241 = vrcp.f32 %v1417_v17 }
 0x41b   : > { %v1429_v50 = vpop.xlane.xlu1 %1428  ;;  %2243 = vrcp.f32 %v1413_v4 }
 0x41c   : > { %2245 = vrcp.f32 %v1431_v52 }
 0x41d   : > { %2247 = vrcp.f32 %v1427_v49 }
 0x41e   : > { %v2236_v58 = vpop.eup %2235 }
 0x41f   : > { %v1433_v37 = vpop.xlane.xlu1 %1432 }
 0x420   : > { %2249 = vrcp.f32 %v1433_v37 }
 0x421   : > { %2251 = vrcp.f32 %v1429_v50 }
 0x422   : > { %v2238_v60 = vpop.eup %2237 }
 0x423   : > { %v2240_v2 = vpop.eup %2239 }
 0x424   : > { %v2242_v9 = vpop.eup %2241 }
 0x425   : > { %v2244_v13 = vpop.eup %2243 }
 0x426   : > { %v2246_v15 = vpop.eup %2245 }
 0x427   : > { %v2248_v23 = vpop.eup %2247 }
 0x42a   : > { %v2250_v46 = vpop.eup %2249 }
 0x42b   : > { %v2252_v32 = vpop.eup %2251 }
 0x43f   : > { %v1964_v16 = vpop.f32.mrb[32].mxu0 }
 0x440   : > { %v1557_v26 = vmul.f32 %v2222_v10, %v1964_v16  ;;  %v1476_v36 = vpop.f32.mrb[33].mxu0 }
 0x441   : > { %v1555_v41 = vmul.f32 %v2224_v18, %v1476_v36  ;;  %v1965_v25 = vpop.f32.mrb[34].mxu0 }
 0x442   : > { %1573 = vst [vmem:[%s2845_s17 + $0x10] sm:$0xff] %v1557_v26  ;;  %v1558_v45 = vmul.f32 %v2226_v39, %v1965_v25  ;;  %v1479_v22 = vpop.f32.mrb[35].mxu0 }
 0x443   : > { %1571 = vst [vmem:[%s2845_s17] sm:$0xff] %v1555_v41  ;;  %v1556_v47 = vmul.f32 %v2228_v28, %v1479_v22 }
 0x444   : > { %1574 = vst [vmem:[%s2845_s17 + $0x18] sm:$0xff] %v1558_v45 }
 0x445   : > { %1572 = vst [vmem:[%s2845_s17 + $0x8] sm:$0xff] %v1556_v47 }
 0x450   : > { %v1972_v55 = vpop.f32.mrb[64].mxu1 }
 0x451   : > { %v1565_v31 = vmul.f32 %v2232_v54, %v1972_v55  ;;  %v1508_v40 = vpop.f32.mrb[65].mxu1 }
 0x452   : > { %v1563_v34 = vmul.f32 %v2234_v56, %v1508_v40  ;;  %v1973_v59 = vpop.f32.mrb[66].mxu1 }
 0x453   : > { %1581 = vst [vmem:[%s2845_s17 + $0x50] sm:$0xff] %v1565_v31  ;;  %v1566_v61 = vmul.f32 %v2236_v58, %v1973_v59  ;;  %v1968_v0 = vpop.f32.mrb[36].mxu0  ;;  %v1511_v1 = vpop.f32.mrb[67].mxu1 }
 0x454   : > { %1579 = vst [vmem:[%s2845_s17 + $0x40] sm:$0xff] %v1563_v34  ;;  %v1561_v3 = vmul.f32 %v2230_v53, %v1968_v0  ;;  %v1564_v7 = vmul.f32 %v2238_v60, %v1511_v1  ;;  %v1492_v8 = vpop.f32.mrb[37].mxu0 }
 0x455   : > { %1582 = vst [vmem:[%s2845_s17 + $0x58] sm:$0xff] %v1566_v61  ;;  %v1559_v51 = vmul.f32 %v2240_v2, %v1492_v8  ;;  %v1969_v12 = vpop.f32.mrb[38].mxu0 }
 0x456   : > { %1577 = vst [vmem:[%s2845_s17 + $0x30] sm:$0xff] %v1561_v3  ;;  %1580 = vst [vmem:[%s2845_s17 + $0x48] sm:$0xff] %v1564_v7  ;;  %v1562_v43 = vmul.f32 %v2242_v9, %v1969_v12  ;;  %v1495_v14 = vpop.f32.mrb[39].mxu0 }
 0x457   : > { %1575 = vst [vmem:[%s2845_s17 + $0x20] sm:$0xff] %v1559_v51  ;;  %v1560_v57 = vmul.f32 %v2244_v13, %v1495_v14 }
 0x458   : > { %1578 = vst [vmem:[%s2845_s17 + $0x38] sm:$0xff] %v1562_v43 }
 0x459   : > { %1576 = vst [vmem:[%s2845_s17 + $0x28] sm:$0xff] %v1560_v57 }
 0x45b   : > { %v1976_v20 = vpop.f32.mrb[68].mxu1 }
 0x45c   : > { %v1569_v24 = vmul.f32 %v2246_v15, %v1976_v20  ;;  %v1524_v27 = vpop.f32.mrb[69].mxu1 }
 0x45d   : > { %v1567_v29 = vmul.f32 %v2248_v23, %v1524_v27  ;;  %v1977_v30 = vpop.f32.mrb[70].mxu1 }
 0x45e   : > { %1585 = vst [vmem:[%s2845_s17 + $0x70] sm:$0xff] %v1569_v24  ;;  %v1570_v21 = vmul.f32 %v2250_v46, %v1977_v30  ;;  %v1527_v33 = vpop.f32.mrb[71].mxu1 }
 0x45f   : > { %1583 = vst [vmem:[%s2845_s17 + $0x60] sm:$0xff] %v1567_v29  ;;  %v1568_v35 = vmul.f32 %v2252_v32, %v1527_v33 }
 0x460   : > { %1586 = vst [vmem:[%s2845_s17 + $0x78] sm:$0xff] %v1570_v21 }
 0x461   : > { %1584 = vst [vmem:[%s2845_s17 + $0x68] sm:$0xff] %v1568_v35 }
 0x462   : > { %2324 = shalt.err (!%p2321_p7)
}
 0x463   : > { %s2325_s24 = scalar_lea.hbm %s2865_s4, 2048  ;;  %s2329_s26 = scalar_lea.hbm %s2916_s2, 4096 }
 0x464   : > { %p2326_p9 = scmp.ne.s32.totalorder %s2865_s4, %s2325_s24  ;;  %p2330_p5 = scmp.lt.u32.totalorder %s2865_s4, %s2916_s2 }
 0x465   : > { %p2331_p11 = scmp.lt.u32.totalorder %s2329_s26, %s2325_s24  ;;  %p2333_p4 = scmp.lt.u32.totalorder %s2325_s24, %s2865_s4 }
 0x466   : > { %p2327_p2 = pnand %p2326_p9, %p2499_p12 }
 0x467   : > { %p2332_p1 = por %p2331_p11, %p2330_p5 }
 0x468   : > { %p2328_p0 = pneg %p2327_p2 }
 0x469   : > { %p2334_p6 = por %p2333_p4, %p2332_p1 }
 0x46b   : > { %p2335_p8 = pnand %p2334_p6, %p2328_p0 }
 0x46d   : > { %2338 = shalt.err (!%p2335_p8)
}
 0x46e   : > { %s2391_s3 = smov 128   ;;  %s2392_s15 = smov 8  }
 0x46f   : > { %2035 = dma.vmem_to_hbm [thread:$0]  (%p2499_p12), %s2867_s19, 2048, %s2865_s4, %s1588_s13, %s2391_s3, %s2391_s3, %s2392_s15  }
 0x470 PF: > { %s1616_s17 = sand.u32 1, %s2369_s9   ;;  %p2931_p10 = scmp.ne.s32.totalorder %s2921_s16, 0 }
 0x471   : > { %p2932_p13 = scmp.ge.s32.totalorder %s2381_s12, 2  ;;  %s1617_s27 = scalar_lea.sflag [#allocation4], %s1616_s17 }
 0x473   : > { %p2046_p3 = pnand %p2932_p13, %p2931_p10 }
 0x475   : > { %2364 = dma.done.wait (!%p2046_p3), %s1617_s27, 2048  }
 0x476   : > { %2366 = vsyncadd (!%p2046_p3), %s1617_s27, 4294965248  ;;  %p16_p7 = scmp.ge.s32.totalorder %s2464_s21, 4   ;;  %s2933_s9 = smov %s2373_s10 }
 0x477   : > { %s2934_s10 = smov %s2377_s11  ;;  %s2935_s11 = smov %s2495_s8 }
 0x478   : > { %s2936_s12 = smov %s2464_s21  ;;  %18 = sbr.rel (!%p16_p7) target bundleno = 6 (0x6), region = 77 }
 0x47f   :  { %1622 = vsyncpa [#allocation3], 1 }
 0x480   :  { %1624 = vsyncpa [#allocation3 + $0x1], 1 }
 0x481   :  { %1625 = vsyncpa [#allocation6], 1 }
 0x482   :  { %1626 = vsyncpa [#allocation4], 1 }
 0x483   :  { %1628 = vsyncpa [#allocation4 + $0x1], 1 }

</bundles_post_ra>
